<compile_context>
chip_gen: v5e
topology: v5e:2x2
jax: 0.10.0
libtpu: 0.0.40
codegen_flags: <defaults>
</compile_context>

<pallas_src>
import math
import functools

import numpy as np
import jax
import jax.numpy as jnp
from jax.experimental import pallas as pl
from jax.experimental.pallas import tpu as pltpu


_NEG_LARGE = -1e30  # finite mask sentinel; avoids exp(-inf - -inf) = NaN


# ----------------------------------------------------------------------------
# shared math helpers (used both inside the kernel and in the pure-JAX ref)
# ----------------------------------------------------------------------------
def _torch_layernorm(x, gamma, beta, eps=1e-6):
    """PyTorch-style LayerNorm from the module: unbiased std, eps on std."""
    H = x.shape[-1]
    mean = jnp.mean(x, axis=-1, keepdims=True)
    var = jnp.sum((x - mean) ** 2, axis=-1, keepdims=True) / (H - 1)
    return gamma * (x - mean) / (jnp.sqrt(var) + eps) + beta


def _gelu_tanh(x):
    return 0.5 * x * (1.0 + jnp.tanh(math.sqrt(2.0 / math.pi)
                                     * (x + 0.044715 * x ** 3)))


# ----------------------------------------------------------------------------
# Pallas kernel: one transformer layer of one batch element, per grid step.
# grid = (B, L); the activation carry is the resident output block.
# ----------------------------------------------------------------------------
def bert_layer_kernel(x_ref, pad_ref,
                      ln1g, ln1b, wqkv, bqkv, wo, bo,
                      ln2g, ln2b, w1, b1, w2, b2,
                      o_ref,
                      q3_s, k3_s, v3_s, ctx_s,
                      *, num_heads, q_tile, dff_tile):
    layer = pl.program_id(1)

    # First layer of this batch element: seed the resident carry from x.
    @pl.when(layer == 0)
    def _():
        o_ref[0] = x_ref[0]

    x = o_ref[0]                       # (S, H) float32 carry (resident in VMEM)
    pad_mask = pad_ref[0] > 0.5        # (1, S) bool, True where key is padding
    S, H = x.shape
    nh = num_heads
    dk = H // nh
    dff = w1.shape[-1]
    bf = jnp.bfloat16

    # ---------------- attention sublayer (pre-norm + residual) ---------------
    xn = _torch_layernorm(x, ln1g[0], ln1b[0]).astype(bf)
    # Fused QKV projection; 1/sqrt(dk) already folded into wq/bq by the wrapper.
    qkv = jnp.dot(xn, wqkv[0], preferred_element_type=jnp.float32) + bqkv[0]

    # Scatter Q/K/V into head-major bf16 scratch once; every head is then a
    # vreg-aligned tile and the per-head matmuls become batched MXU passes.
    for h in range(nh):
        q3_s[h] = qkv[:, h * dk:(h + 1) * dk].astype(bf)
        k3_s[h] = qkv[:, H + h * dk:H + (h + 1) * dk].astype(bf)
        v3_s[h] = qkv[:, 2 * H + h * dk:2 * H + (h + 1) * dk].astype(bf)

    kh = k3_s[...]                     # (nh, S, dk) bf16
    vh = v3_s[...]
    n_qt = S // q_tile
    for t in range(n_qt):              # query tiles bound the live score block
        qh = q3_s[:, t * q_tile:(t + 1) * q_tile, :]           # (nh, tq, dk)
        s = jnp.einsum('hqd,hkd->hqk', qh, kh,
                       preferred_element_type=jnp.float32)     # (nh, tq, S)
        s = jnp.where(pad_mask[None, :, :], _NEG_LARGE, s)
        m = jnp.max(s, axis=-1, keepdims=True)
        e = jnp.exp(s - m)
        p = e * pl.reciprocal(jnp.sum(e, axis=-1, keepdims=True), approx=True)
        ctx_t = jnp.einsum('hqk,hkd->hqd', p.astype(bf), vh,
                           preferred_element_type=jnp.float32)  # (nh, tq, dk)
        for h in range(nh):
            ctx_s[t * q_tile:(t + 1) * q_tile,
                  h * dk:(h + 1) * dk] = ctx_t[h].astype(bf)

    attn = jnp.dot(ctx_s[...], wo[0], preferred_element_type=jnp.float32) + bo[0]
    x1 = x + attn

    # ---------------- feed-forward sublayer, streamed over dff ---------------
    xn2 = _torch_layernorm(x1, ln2g[0], ln2b[0]).astype(bf)
    acc = jnp.zeros((S, H), jnp.float32)
    for ft in range(dff // dff_tile):
        lo, hi = ft * dff_tile, (ft + 1) * dff_tile
        h1 = jnp.dot(xn2, w1[0, :, lo:hi],
                     preferred_element_type=jnp.float32) + b1[0, :, lo:hi]
        g = _gelu_tanh(h1).astype(bf)
        acc = acc + jnp.dot(g, w2[0, lo:hi, :],
                            preferred_element_type=jnp.float32)

    o_ref[0] = x1 + acc + b2[0]


# ----------------------------------------------------------------------------
# wrapper: stack per-layer weights, build specs, launch one pallas_call
# ----------------------------------------------------------------------------
def _vmem_limit_bytes():
    try:
        phys = int(pltpu.get_tpu_info().vmem_capacity_bytes)
    except Exception:
        phys = 64 * 1024 * 1024          # v7x-safe fallback
    # ~85% of physical, capped at 100 MiB (review: ~100 MiB v5e/v6e, <=56 MiB v7x)
    return max(32 * 1024 * 1024, min(int(phys * 0.85), 100 * 1024 * 1024))


def _pick_tile(total, preferred):
    if total <= preferred:
        return total
    return preferred if total % preferred == 0 else total


def bert_layers_pallas(x, key_pad, layer_params, num_heads):
    """x: (B,S,H) f32, key_pad: (B,1,S) f32 (1.0 at padding keys)."""
    B, S, H = x.shape
    L = len(layer_params)
    assert H % num_heads == 0, "hidden must be divisible by attn_heads"
    dk = H // num_heads
    dff = layer_params[0]['w1'].shape[-1]
    scale = 1.0 / math.sqrt(dk)
    bf = jnp.bfloat16

    def stack(fn):
        return jnp.stack([fn(p) for p in layer_params])

    # fused QKV with 1/sqrt(dk) folded into the Q slice; matmul weights in bf16
    wqkv = stack(lambda p: jnp.concatenate(
        [p['wq'] * scale, p['wk'], p['wv']], axis=1)).astype(bf)     # (L,H,3H)
    bqkv = stack(lambda p: jnp.concatenate(
        [p['bq'] * scale, p['bk'], p['bv']], axis=1))                # (L,1,3H)
    ln1g = stack(lambda p: p['ln1g']); ln1b = stack(lambda p: p['ln1b'])
    wo = stack(lambda p: p['wo']).astype(bf); bo = stack(lambda p: p['bo'])
    ln2g = stack(lambda p: p['ln2g']); ln2b = stack(lambda p: p['ln2b'])
    w1 = stack(lambda p: p['w1']).astype(bf); b1 = stack(lambda p: p['b1'])
    w2 = stack(lambda p: p['w2']).astype(bf); b2 = stack(lambda p: p['b2'])

    weights = [ln1g, ln1b, wqkv, bqkv, wo, bo, ln2g, ln2b, w1, b1, w2, b2]

    def w_spec(arr):
        # one layer-slab per grid step; double-buffering of this block is what
        # overlaps layer l+1's weight DMA with layer l's compute.
        return pl.BlockSpec((1,) + arr.shape[1:], lambda b, l: (l, 0, 0))

    in_specs = ([pl.BlockSpec((1, S, H), lambda b, l: (b, 0, 0)),
                 pl.BlockSpec((1, 1, S), lambda b, l: (b, 0, 0))]
                + [w_spec(w) for w in weights])

    q_tile = _pick_tile(S, 256)
    dff_tile = _pick_tile(dff, 512)

    kernel = functools.partial(bert_layer_kernel, num_heads=num_heads,
                               q_tile=q_tile, dff_tile=dff_tile)

    return pl.pallas_call(
        kernel,
        out_shape=jax.ShapeDtypeStruct((B, S, H), jnp.float32),
        grid_spec=pltpu.PrefetchScalarGridSpec(
            num_scalar_prefetch=0,
            grid=(B, L),                        # layer axis innermost
            in_specs=in_specs,
            out_specs=pl.BlockSpec((1, S, H), lambda b, l: (b, 0, 0)),
            scratch_shapes=[
                pltpu.VMEM((num_heads, S, dk), jnp.bfloat16),   # Q, head-major
                pltpu.VMEM((num_heads, S, dk), jnp.bfloat16),   # K, head-major
                pltpu.VMEM((num_heads, S, dk), jnp.bfloat16),   # V, head-major
                pltpu.VMEM((S, H), jnp.bfloat16),               # ctx (bf16)
            ]),
        compiler_params=pltpu.CompilerParams(
            dimension_semantics=("parallel", "arbitrary"),
            vmem_limit_bytes=_vmem_limit_bytes()),
    )(x, key_pad, *weights)


# ----------------------------------------------------------------------------
# BERT forward: embedding glue + fused transformer stack
# ----------------------------------------------------------------------------
def bert_forward(params, token_seq, num_heads):
    B, S = token_seq.shape
    # BERTEmbedding: token (+ positional); optional itype/opnd_type/reg_*/eflags
    # sequences are None in this run. Dropout = identity (eval).
    # TODO(synk): add the optional auxiliary embedding lookups here when those
    # sequences are provided.
    x = params['token_emb'][token_seq] + params['pe'][:S][None, :, :]
    # key-padding vector only; the torch (B,1,S,S) mask is rebuilt in-kernel by
    # a broadcasted compare (heads/query dims are pure broadcast).
    key_pad = (token_seq == 0).astype(jnp.float32)[:, None, :]   # (B, 1, S)
    return bert_layers_pallas(x, key_pad, params['layers'], num_heads)


# ----------------------------------------------------------------------------
# pure-JAX reference (same math + same bf16 operand precision) for correctness
# ----------------------------------------------------------------------------
def ref_block(x, key_pad, p, num_heads):
    B, S, H = x.shape
    dk = H // num_heads
    bf = jnp.bfloat16
    scale = 1.0 / math.sqrt(dk)
    wq = (p['wq'] * scale).astype(bf)
    wk = p['wk'].astype(bf); wv = p['wv'].astype(bf)
    wo = p['wo'].astype(bf); w1 = p['w1'].astype(bf); w2 = p['w2'].astype(bf)

    xn = _torch_layernorm(x, p['ln1g'][0], p['ln1b'][0]).astype(bf)
    q = jnp.dot(xn, wq, preferred_element_type=jnp.float32) + p['bq'][0] * scale
    k = jnp.dot(xn, wk, preferred_element_type=jnp.float32) + p['bk'][0]
    v = jnp.dot(xn, wv, preferred_element_type=jnp.float32) + p['bv'][0]

    q4 = q.reshape(B, S, num_heads, dk).transpose(0, 2, 1, 3).astype(bf)
    k4 = k.reshape(B, S, num_heads, dk).transpose(0, 2, 1, 3).astype(bf)
    v4 = v.reshape(B, S, num_heads, dk).transpose(0, 2, 1, 3).astype(bf)
    s = jnp.einsum('bhqd,bhkd->bhqk', q4, k4, preferred_element_type=jnp.float32)
    s = jnp.where(key_pad[:, :, None, :] > 0.5, _NEG_LARGE, s)
    m = jnp.max(s, axis=-1, keepdims=True)
    e = jnp.exp(s - m)
    pa = e / jnp.sum(e, axis=-1, keepdims=True)
    ctx = jnp.einsum('bhqk,bhkd->bhqd', pa.astype(bf), v4,
                     preferred_element_type=jnp.float32)
    ctx = ctx.transpose(0, 2, 1, 3).reshape(B, S, H)
    x1 = x + jnp.dot(ctx.astype(bf), wo,
                     preferred_element_type=jnp.float32) + p['bo'][0]

    xn2 = _torch_layernorm(x1, p['ln2g'][0], p['ln2b'][0]).astype(bf)
    h1 = jnp.dot(xn2, w1, preferred_element_type=jnp.float32) + p['b1'][0]
    g = _gelu_tanh(h1).astype(bf)
    return x1 + jnp.dot(g, w2, preferred_element_type=jnp.float32) + p['b2'][0]


def ref_forward(params, token_seq, num_heads):
    B, S = token_seq.shape
    x = params['token_emb'][token_seq] + params['pe'][:S][None, :, :]
    key_pad = (token_seq == 0).astype(jnp.float32)[:, None, :]
    for lp in params['layers']:
        x = ref_block(x, key_pad, lp, num_heads)
    return x


# ----------------------------------------------------------------------------
# deterministic parameter init (shapes match the PyTorch module)
# ----------------------------------------------------------------------------
def init_bert_params(key, vocab, hidden, dff, n_layers, max_len=512):
    keys = jax.random.split(key, 1 + n_layers)
    tok = 0.02 * jax.random.normal(keys[0], (vocab, hidden), jnp.float32)
    tok = tok.at[0].set(0.0)                       # padding_idx=0

    # sinusoidal positional embedding (PositionalEmbedding)
    pos = jnp.arange(max_len, dtype=jnp.float32)[:, None]
    div = jnp.exp(jnp.arange(0, hidden, 2, dtype=jnp.float32)
                  * -(math.log(10000.0) / hidden))
    pe = jnp.zeros((max_len, hidden), jnp.float32)
    pe = pe.at[:, 0::2].set(jnp.sin(pos * div))
    pe = pe.at[:, 1::2].set(jnp.cos(pos * div))

    def lin(k, din, dout):
        # nn.Linear-style uniform init; stored pre-transposed as (in, out)
        bound = 1.0 / math.sqrt(din)
        kw, kb = jax.random.split(k)
        W = jax.random.uniform(kw, (din, dout), jnp.float32, -bound, bound)
        b = jax.random.uniform(kb, (1, dout), jnp.float32, -bound, bound)
        return W, b

    layers = []
    for i in range(n_layers):
        lk = jax.random.split(keys[1 + i], 6)
        wq, bq = lin(lk[0], hidden, hidden)
        wk, bk = lin(lk[1], hidden, hidden)
        wv, bv = lin(lk[2], hidden, hidden)
        wo, bo = lin(lk[3], hidden, hidden)
        w1, b1 = lin(lk[4], hidden, dff)
        w2, b2 = lin(lk[5], dff, hidden)
        layers.append(dict(
            ln1g=jnp.ones((1, hidden), jnp.float32),
            ln1b=jnp.zeros((1, hidden), jnp.float32),
            wq=wq, bq=bq, wk=wk, bk=bk, wv=wv, bv=bv, wo=wo, bo=bo,
            ln2g=jnp.ones((1, hidden), jnp.float32),
            ln2b=jnp.zeros((1, hidden), jnp.float32),
            w1=w1, b1=b1, w2=w2, b2=b2))
    return dict(token_emb=tok, pe=pe, layers=layers)


if __name__ == "__main__":
    B, S, HIDDEN, HEADS, LAYERS = 2, 8, 32, 4, 2
    DFF = 4 * HIDDEN
    TOKEN_VOCAB = 100

    key = jax.random.PRNGKey(0)
    k_param, k_tok = jax.random.split(key)
    params = init_bert_params(k_param, TOKEN_VOCAB, HIDDEN, DFF, LAYERS)

    token_seq = jax.random.randint(k_tok, (B, S), 1, TOKEN_VOCAB, dtype=jnp.int32)
    token_seq = token_seq.at[1, -1].set(0)     # one padding position -> exercises mask

    out = bert_forward(params, token_seq, HEADS)
    out = jax.block_until_ready(out)

    ref = jax.block_until_ready(ref_forward(params, token_seq, HEADS))
    np.testing.assert_allclose(np.asarray(out), np.asarray(ref),
                               rtol=1e-2, atol=1e-2)
    assert out.shape == (B, S, HIDDEN)
    assert not np.any(np.isnan(np.asarray(out)))
    print("KERNEL_OK")
</pallas_src>

<mosaic_0001>
module attributes {stable_mosaic.version = 11 : i64} {
  func.func @bert_layer_kernel(%arg0: i32, %arg1: i32, %arg2: memref<1x8x32xf32, #tpu.memory_space<vmem>>, %arg3: memref<1x1x8xf32, #tpu.memory_space<vmem>>, %arg4: memref<1x1x32xf32, #tpu.memory_space<vmem>>, %arg5: memref<1x1x32xf32, #tpu.memory_space<vmem>>, %arg6: memref<1x32x96xbf16, #tpu.memory_space<vmem>>, %arg7: memref<1x1x96xf32, #tpu.memory_space<vmem>>, %arg8: memref<1x32x32xbf16, #tpu.memory_space<vmem>>, %arg9: memref<1x1x32xf32, #tpu.memory_space<vmem>>, %arg10: memref<1x1x32xf32, #tpu.memory_space<vmem>>, %arg11: memref<1x1x32xf32, #tpu.memory_space<vmem>>, %arg12: memref<1x32x128xbf16, #tpu.memory_space<vmem>>, %arg13: memref<1x1x128xf32, #tpu.memory_space<vmem>>, %arg14: memref<1x128x32xbf16, #tpu.memory_space<vmem>>, %arg15: memref<1x1x32xf32, #tpu.memory_space<vmem>>, %arg16: memref<1x8x32xf32, #tpu.memory_space<vmem>>, %arg17: memref<4x8x8xbf16, #tpu.memory_space<vmem>>, %arg18: memref<4x8x8xbf16, #tpu.memory_space<vmem>>, %arg19: memref<4x8x8xbf16, #tpu.memory_space<vmem>>, %arg20: memref<8x32xbf16, #tpu.memory_space<vmem>>) attributes {dimension_semantics = [#tpu.dimension_semantics<parallel>, #tpu.dimension_semantics<arbitrary>], iteration_bounds = array<i64: 2, 2>, scalar_prefetch = 0 : i64, scratch_operands = 4 : i64, tpu.core_type = #tpu.core_type<tc>, window_params = [{transform_indices = @transform_0, window_bounds = array<i64: 1, 8, 32>}, {transform_indices = @transform_1, window_bounds = array<i64: 1, 1, 8>}, {transform_indices = @transform_2, window_bounds = array<i64: 1, 1, 32>}, {transform_indices = @transform_3, window_bounds = array<i64: 1, 1, 32>}, {transform_indices = @transform_4, window_bounds = array<i64: 1, 32, 96>}, {transform_indices = @transform_5, window_bounds = array<i64: 1, 1, 96>}, {transform_indices = @transform_6, window_bounds = array<i64: 1, 32, 32>}, {transform_indices = @transform_7, window_bounds = array<i64: 1, 1, 32>}, {transform_indices = @transform_8, window_bounds = array<i64: 1, 1, 32>}, {transform_indices = @transform_9, window_bounds = array<i64: 1, 1, 32>}, {transform_indices = @transform_10, window_bounds = array<i64: 1, 32, 128>}, {transform_indices = @transform_11, window_bounds = array<i64: 1, 1, 128>}, {transform_indices = @transform_12, window_bounds = array<i64: 1, 128, 32>}, {transform_indices = @transform_13, window_bounds = array<i64: 1, 1, 32>}, {transform_indices = @transform_14, window_bounds = array<i64: 1, 8, 32>}]} {
    %c0_i32 = arith.constant 0 : i32
    %0 = arith.cmpi eq, %arg1, %c0_i32 : i32
    %1 = arith.extui %0 : i1 to i32
    %c0_i32_0 = arith.constant 0 : i32
    %2 = arith.cmpi ne, %1, %c0_i32_0 : i32
    scf.if %2 {
      %c0_118 = arith.constant 0 : index
      %c0_119 = arith.constant 0 : index
      %c0_120 = arith.constant 0 : index
      %210 = vector.load %arg2[%c0_118, %c0_119, %c0_120] : memref<1x8x32xf32, #tpu.memory_space<vmem>>, vector<1x8x32xf32>
      %211 = vector.shape_cast %210 : vector<1x8x32xf32> to vector<8x32xf32>
      %c0_121 = arith.constant 0 : index
      %c0_122 = arith.constant 0 : index
      %c0_123 = arith.constant 0 : index
      %212 = vector.load %arg16[%c0_121, %c0_122, %c0_123] : memref<1x8x32xf32, #tpu.memory_space<vmem>>, vector<1x8x32xf32>
      %213 = vector.shape_cast %212 : vector<1x8x32xf32> to vector<8x32xf32>
      %214 = vector.shape_cast %211 : vector<8x32xf32> to vector<1x8x32xf32>
      tpu.vector_store %arg16[%c0_121, %c0_122, %c0_123], %214 {strides = array<i32>} : memref<1x8x32xf32, #tpu.memory_space<vmem>>, vector<1x8x32xf32>,
    } else {
    }
    %c0 = arith.constant 0 : index
    %c0_1 = arith.constant 0 : index
    %c0_2 = arith.constant 0 : index
    %3 = vector.load %arg16[%c0, %c0_1, %c0_2] : memref<1x8x32xf32, #tpu.memory_space<vmem>>, vector<1x8x32xf32>
    %4 = vector.shape_cast %3 : vector<1x8x32xf32> to vector<8x32xf32>
    %c0_3 = arith.constant 0 : index
    %c0_4 = arith.constant 0 : index
    %c0_5 = arith.constant 0 : index
    %5 = vector.load %arg3[%c0_3, %c0_4, %c0_5] : memref<1x1x8xf32, #tpu.memory_space<vmem>>, vector<1x1x8xf32>
    %6 = vector.shape_cast %5 : vector<1x1x8xf32> to vector<1x8xf32>
    %cst = arith.constant 5.000000e-01 : f32
    %7 = vector.broadcast %cst : f32 to vector<1x8xf32>
    %8 = arith.cmpf ogt, %6, %7 : vector<1x8xf32>
    %c0_6 = arith.constant 0 : index
    %c0_7 = arith.constant 0 : index
    %c0_8 = arith.constant 0 : index
    %9 = vector.load %arg4[%c0_6, %c0_7, %c0_8] : memref<1x1x32xf32, #tpu.memory_space<vmem>>, vector<1x1x32xf32>
    %10 = vector.shape_cast %9 : vector<1x1x32xf32> to vector<1x32xf32>
    %c0_9 = arith.constant 0 : index
    %c0_10 = arith.constant 0 : index
    %c0_11 = arith.constant 0 : index
    %11 = vector.load %arg5[%c0_9, %c0_10, %c0_11] : memref<1x1x32xf32, #tpu.memory_space<vmem>>, vector<1x1x32xf32>
    %12 = vector.shape_cast %11 : vector<1x1x32xf32> to vector<1x32xf32>
    %cst_12 = arith.constant dense<0.000000e+00> : vector<8xf32>
    %13 = vector.multi_reduction <add>, %4, %cst_12 [1] : vector<8x32xf32> to vector<8xf32>
    %14 = vector.shape_cast %13 : vector<8xf32> to vector<8x1xf32>
    %cst_13 = arith.constant 3.200000e+01 : f32
    %15 = vector.broadcast %cst_13 : f32 to vector<8x1xf32>
    %16 = arith.divf %14, %15 : vector<8x1xf32>
    %17 = vector.broadcast %16 : vector<8x1xf32> to vector<8x32xf32>
    %18 = arith.subf %4, %17 : vector<8x32xf32>
    %19 = arith.mulf %18, %18 : vector<8x32xf32>
    %cst_14 = arith.constant dense<0.000000e+00> : vector<8xf32>
    %20 = vector.multi_reduction <add>, %19, %cst_14 [1] : vector<8x32xf32> to vector<8xf32>
    %21 = vector.shape_cast %20 : vector<8xf32> to vector<8x1xf32>
    %cst_15 = arith.constant 3.100000e+01 : f32
    %22 = vector.broadcast %cst_15 : f32 to vector<8x1xf32>
    %23 = arith.divf %21, %22 : vector<8x1xf32>
    %24 = vector.broadcast %16 : vector<8x1xf32> to vector<8x32xf32>
    %25 = arith.subf %4, %24 : vector<8x32xf32>
    %26 = vector.broadcast %10 : vector<1x32xf32> to vector<8x32xf32>
    %27 = arith.mulf %26, %25 : vector<8x32xf32>
    %28 = math.sqrt %23 : vector<8x1xf32>
    %cst_16 = arith.constant 9.99999997E-7 : f32
    %29 = vector.broadcast %cst_16 : f32 to vector<8x1xf32>
    %30 = arith.addf %28, %29 : vector<8x1xf32>
    %31 = vector.broadcast %30 : vector<8x1xf32> to vector<8x32xf32>
    %32 = arith.divf %27, %31 : vector<8x32xf32>
    %33 = vector.broadcast %12 : vector<1x32xf32> to vector<8x32xf32>
    %34 = arith.addf %32, %33 : vector<8x32xf32>
    %35 = arith.truncf %34 : vector<8x32xf32> to vector<8x32xbf16>
    %c0_17 = arith.constant 0 : index
    %c0_18 = arith.constant 0 : index
    %c0_19 = arith.constant 0 : index
    %36 = vector.load %arg6[%c0_17, %c0_18, %c0_19] : memref<1x32x96xbf16, #tpu.memory_space<vmem>>, vector<1x32x96xbf16>
    %37 = vector.shape_cast %36 : vector<1x32x96xbf16> to vector<32x96xbf16>
    %cst_20 = arith.constant dense<0.000000e+00> : vector<8x96xf32>
    %38 = tpu.matmul %35, %37, %cst_20 {dimension_numbers = #tpu.dot_dimension_numbers<[1], [0], [0], [1], [0, 0, 1, 1], [], []>} : vector<8x32xbf16>, vector<32x96xbf16>, vector<8x96xf32> -> vector<8x96xf32>
    %c0_21 = arith.constant 0 : index
    %c0_22 = arith.constant 0 : index
    %c0_23 = arith.constant 0 : index
    %39 = vector.load %arg7[%c0_21, %c0_22, %c0_23] : memref<1x1x96xf32, #tpu.memory_space<vmem>>, vector<1x1x96xf32>
    %40 = vector.shape_cast %39 : vector<1x1x96xf32> to vector<1x96xf32>
    %41 = vector.broadcast %40 : vector<1x96xf32> to vector<8x96xf32>
    %42 = arith.addf %38, %41 : vector<8x96xf32>
    %43 = vector.extract_strided_slice %42 {offsets = [0, 0], sizes = [8, 8], strides = [1, 1]} : vector<8x96xf32> to vector<8x8xf32>
    %44 = arith.truncf %43 : vector<8x8xf32> to vector<8x8xbf16>
    %c0_24 = arith.constant 0 : index
    %c0_25 = arith.constant 0 : index
    %c0_26 = arith.constant 0 : index
    %45 = vector.load %arg17[%c0_24, %c0_25, %c0_26] : memref<4x8x8xbf16, #tpu.memory_space<vmem>>, vector<1x8x8xbf16>
    %46 = vector.shape_cast %45 : vector<1x8x8xbf16> to vector<8x8xbf16>
    %47 = vector.shape_cast %44 : vector<8x8xbf16> to vector<1x8x8xbf16>
    tpu.vector_store %arg17[%c0_24, %c0_25, %c0_26], %47 {strides = array<i32>} : memref<4x8x8xbf16, #tpu.memory_space<vmem>>, vector<1x8x8xbf16>,
    %48 = vector.extract_strided_slice %42 {offsets = [0, 32], sizes = [8, 8], strides = [1, 1]} : vector<8x96xf32> to vector<8x8xf32>
    %49 = arith.truncf %48 : vector<8x8xf32> to vector<8x8xbf16>
    %c0_27 = arith.constant 0 : index
    %c0_28 = arith.constant 0 : index
    %c0_29 = arith.constant 0 : index
    %50 = vector.load %arg18[%c0_27, %c0_28, %c0_29] : memref<4x8x8xbf16, #tpu.memory_space<vmem>>, vector<1x8x8xbf16>
    %51 = vector.shape_cast %50 : vector<1x8x8xbf16> to vector<8x8xbf16>
    %52 = vector.shape_cast %49 : vector<8x8xbf16> to vector<1x8x8xbf16>
    tpu.vector_store %arg18[%c0_27, %c0_28, %c0_29], %52 {strides = array<i32>} : memref<4x8x8xbf16, #tpu.memory_space<vmem>>, vector<1x8x8xbf16>,
    %53 = vector.extract_strided_slice %42 {offsets = [0, 64], sizes = [8, 8], strides = [1, 1]} : vector<8x96xf32> to vector<8x8xf32>
    %54 = arith.truncf %53 : vector<8x8xf32> to vector<8x8xbf16>
    %c0_30 = arith.constant 0 : index
    %c0_31 = arith.constant 0 : index
    %c0_32 = arith.constant 0 : index
    %55 = vector.load %arg19[%c0_30, %c0_31, %c0_32] : memref<4x8x8xbf16, #tpu.memory_space<vmem>>, vector<1x8x8xbf16>
    %56 = vector.shape_cast %55 : vector<1x8x8xbf16> to vector<8x8xbf16>
    %57 = vector.shape_cast %54 : vector<8x8xbf16> to vector<1x8x8xbf16>
    tpu.vector_store %arg19[%c0_30, %c0_31, %c0_32], %57 {strides = array<i32>} : memref<4x8x8xbf16, #tpu.memory_space<vmem>>, vector<1x8x8xbf16>,
    %58 = vector.extract_strided_slice %42 {offsets = [0, 8], sizes = [8, 8], strides = [1, 1]} : vector<8x96xf32> to vector<8x8xf32>
    %59 = arith.truncf %58 : vector<8x8xf32> to vector<8x8xbf16>
    %c1 = arith.constant 1 : index
    %c0_33 = arith.constant 0 : index
    %c0_34 = arith.constant 0 : index
    %60 = vector.load %arg17[%c1, %c0_33, %c0_34] : memref<4x8x8xbf16, #tpu.memory_space<vmem>>, vector<1x8x8xbf16>
    %61 = vector.shape_cast %60 : vector<1x8x8xbf16> to vector<8x8xbf16>
    %62 = vector.shape_cast %59 : vector<8x8xbf16> to vector<1x8x8xbf16>
    tpu.vector_store %arg17[%c1, %c0_33, %c0_34], %62 {strides = array<i32>} : memref<4x8x8xbf16, #tpu.memory_space<vmem>>, vector<1x8x8xbf16>,
    %63 = vector.extract_strided_slice %42 {offsets = [0, 40], sizes = [8, 8], strides = [1, 1]} : vector<8x96xf32> to vector<8x8xf32>
    %64 = arith.truncf %63 : vector<8x8xf32> to vector<8x8xbf16>
    %c1_35 = arith.constant 1 : index
    %c0_36 = arith.constant 0 : index
    %c0_37 = arith.constant 0 : index
    %65 = vector.load %arg18[%c1_35, %c0_36, %c0_37] : memref<4x8x8xbf16, #tpu.memory_space<vmem>>, vector<1x8x8xbf16>
    %66 = vector.shape_cast %65 : vector<1x8x8xbf16> to vector<8x8xbf16>
    %67 = vector.shape_cast %64 : vector<8x8xbf16> to vector<1x8x8xbf16>
    tpu.vector_store %arg18[%c1_35, %c0_36, %c0_37], %67 {strides = array<i32>} : memref<4x8x8xbf16, #tpu.memory_space<vmem>>, vector<1x8x8xbf16>,
    %68 = vector.extract_strided_slice %42 {offsets = [0, 72], sizes = [8, 8], strides = [1, 1]} : vector<8x96xf32> to vector<8x8xf32>
    %69 = arith.truncf %68 : vector<8x8xf32> to vector<8x8xbf16>
    %c1_38 = arith.constant 1 : index
    %c0_39 = arith.constant 0 : index
    %c0_40 = arith.constant 0 : index
    %70 = vector.load %arg19[%c1_38, %c0_39, %c0_40] : memref<4x8x8xbf16, #tpu.memory_space<vmem>>, vector<1x8x8xbf16>
    %71 = vector.shape_cast %70 : vector<1x8x8xbf16> to vector<8x8xbf16>
    %72 = vector.shape_cast %69 : vector<8x8xbf16> to vector<1x8x8xbf16>
    tpu.vector_store %arg19[%c1_38, %c0_39, %c0_40], %72 {strides = array<i32>} : memref<4x8x8xbf16, #tpu.memory_space<vmem>>, vector<1x8x8xbf16>,
    %73 = vector.extract_strided_slice %42 {offsets = [0, 16], sizes = [8, 8], strides = [1, 1]} : vector<8x96xf32> to vector<8x8xf32>
    %74 = arith.truncf %73 : vector<8x8xf32> to vector<8x8xbf16>
    %c2 = arith.constant 2 : index
    %c0_41 = arith.constant 0 : index
    %c0_42 = arith.constant 0 : index
    %75 = vector.load %arg17[%c2, %c0_41, %c0_42] : memref<4x8x8xbf16, #tpu.memory_space<vmem>>, vector<1x8x8xbf16>
    %76 = vector.shape_cast %75 : vector<1x8x8xbf16> to vector<8x8xbf16>
    %77 = vector.shape_cast %74 : vector<8x8xbf16> to vector<1x8x8xbf16>
    tpu.vector_store %arg17[%c2, %c0_41, %c0_42], %77 {strides = array<i32>} : memref<4x8x8xbf16, #tpu.memory_space<vmem>>, vector<1x8x8xbf16>,
    %78 = vector.extract_strided_slice %42 {offsets = [0, 48], sizes = [8, 8], strides = [1, 1]} : vector<8x96xf32> to vector<8x8xf32>
    %79 = arith.truncf %78 : vector<8x8xf32> to vector<8x8xbf16>
    %c2_43 = arith.constant 2 : index
    %c0_44 = arith.constant 0 : index
    %c0_45 = arith.constant 0 : index
    %80 = vector.load %arg18[%c2_43, %c0_44, %c0_45] : memref<4x8x8xbf16, #tpu.memory_space<vmem>>, vector<1x8x8xbf16>
    %81 = vector.shape_cast %80 : vector<1x8x8xbf16> to vector<8x8xbf16>
    %82 = vector.shape_cast %79 : vector<8x8xbf16> to vector<1x8x8xbf16>
    tpu.vector_store %arg18[%c2_43, %c0_44, %c0_45], %82 {strides = array<i32>} : memref<4x8x8xbf16, #tpu.memory_space<vmem>>, vector<1x8x8xbf16>,
    %83 = vector.extract_strided_slice %42 {offsets = [0, 80], sizes = [8, 8], strides = [1, 1]} : vector<8x96xf32> to vector<8x8xf32>
    %84 = arith.truncf %83 : vector<8x8xf32> to vector<8x8xbf16>
    %c2_46 = arith.constant 2 : index
    %c0_47 = arith.constant 0 : index
    %c0_48 = arith.constant 0 : index
    %85 = vector.load %arg19[%c2_46, %c0_47, %c0_48] : memref<4x8x8xbf16, #tpu.memory_space<vmem>>, vector<1x8x8xbf16>
    %86 = vector.shape_cast %85 : vector<1x8x8xbf16> to vector<8x8xbf16>
    %87 = vector.shape_cast %84 : vector<8x8xbf16> to vector<1x8x8xbf16>
    tpu.vector_store %arg19[%c2_46, %c0_47, %c0_48], %87 {strides = array<i32>} : memref<4x8x8xbf16, #tpu.memory_space<vmem>>, vector<1x8x8xbf16>,
    %88 = vector.extract_strided_slice %42 {offsets = [0, 24], sizes = [8, 8], strides = [1, 1]} : vector<8x96xf32> to vector<8x8xf32>
    %89 = arith.truncf %88 : vector<8x8xf32> to vector<8x8xbf16>
    %c3 = arith.constant 3 : index
    %c0_49 = arith.constant 0 : index
    %c0_50 = arith.constant 0 : index
    %90 = vector.load %arg17[%c3, %c0_49, %c0_50] : memref<4x8x8xbf16, #tpu.memory_space<vmem>>, vector<1x8x8xbf16>
    %91 = vector.shape_cast %90 : vector<1x8x8xbf16> to vector<8x8xbf16>
    %92 = vector.shape_cast %89 : vector<8x8xbf16> to vector<1x8x8xbf16>
    tpu.vector_store %arg17[%c3, %c0_49, %c0_50], %92 {strides = array<i32>} : memref<4x8x8xbf16, #tpu.memory_space<vmem>>, vector<1x8x8xbf16>,
    %93 = vector.extract_strided_slice %42 {offsets = [0, 56], sizes = [8, 8], strides = [1, 1]} : vector<8x96xf32> to vector<8x8xf32>
    %94 = arith.truncf %93 : vector<8x8xf32> to vector<8x8xbf16>
    %c3_51 = arith.constant 3 : index
    %c0_52 = arith.constant 0 : index
    %c0_53 = arith.constant 0 : index
    %95 = vector.load %arg18[%c3_51, %c0_52, %c0_53] : memref<4x8x8xbf16, #tpu.memory_space<vmem>>, vector<1x8x8xbf16>
    %96 = vector.shape_cast %95 : vector<1x8x8xbf16> to vector<8x8xbf16>
    %97 = vector.shape_cast %94 : vector<8x8xbf16> to vector<1x8x8xbf16>
    tpu.vector_store %arg18[%c3_51, %c0_52, %c0_53], %97 {strides = array<i32>} : memref<4x8x8xbf16, #tpu.memory_space<vmem>>, vector<1x8x8xbf16>,
    %98 = vector.extract_strided_slice %42 {offsets = [0, 88], sizes = [8, 8], strides = [1, 1]} : vector<8x96xf32> to vector<8x8xf32>
    %99 = arith.truncf %98 : vector<8x8xf32> to vector<8x8xbf16>
    %c3_54 = arith.constant 3 : index
    %c0_55 = arith.constant 0 : index
    %c0_56 = arith.constant 0 : index
    %100 = vector.load %arg19[%c3_54, %c0_55, %c0_56] : memref<4x8x8xbf16, #tpu.memory_space<vmem>>, vector<1x8x8xbf16>
    %101 = vector.shape_cast %100 : vector<1x8x8xbf16> to vector<8x8xbf16>
    %102 = vector.shape_cast %99 : vector<8x8xbf16> to vector<1x8x8xbf16>
    tpu.vector_store %arg19[%c3_54, %c0_55, %c0_56], %102 {strides = array<i32>} : memref<4x8x8xbf16, #tpu.memory_space<vmem>>, vector<1x8x8xbf16>,
    %c0_57 = arith.constant 0 : index
    %c0_58 = arith.constant 0 : index
    %c0_59 = arith.constant 0 : index
    %103 = vector.load %arg18[%c0_57, %c0_58, %c0_59] : memref<4x8x8xbf16, #tpu.memory_space<vmem>>, vector<4x8x8xbf16>
    %c0_60 = arith.constant 0 : index
    %c0_61 = arith.constant 0 : index
    %c0_62 = arith.constant 0 : index
    %104 = vector.load %arg19[%c0_60, %c0_61, %c0_62] : memref<4x8x8xbf16, #tpu.memory_space<vmem>>, vector<4x8x8xbf16>
    %c0_63 = arith.constant 0 : index
    %c0_64 = arith.constant 0 : index
    %c0_65 = arith.constant 0 : index
    %105 = vector.load %arg17[%c0_63, %c0_64, %c0_65] : memref<4x8x8xbf16, #tpu.memory_space<vmem>>, vector<4x8x8xbf16>
    "tpu.trace_start"() <{level = 10 : i32, message = "hqd,hkd->hqk"}> : () -> ()
    %cst_66 = arith.constant dense<0.000000e+00> : vector<4x8x8xf32>
    %106 = tpu.matmul %105, %103, %cst_66 {dimension_numbers = #tpu.dot_dimension_numbers<[2], [2], [1], [1], [0, 0, 0, 1, 1, 1], [0], [0]>} : vector<4x8x8xbf16>, vector<4x8x8xbf16>, vector<4x8x8xf32> -> vector<4x8x8xf32>
    "tpu.trace_stop"() : () -> ()
    %107 = vector.shape_cast %8 : vector<1x8xi1> to vector<1x1x8xi1>
    %cst_67 = arith.constant -1.000000e+30 : f32
    %108 = vector.shape_cast %107 : vector<1x1x8xi1> to vector<1x1x8xi1>
    %109 = vector.broadcast %108 : vector<1x1x8xi1> to vector<4x8x8xi1>
    %110 = vector.broadcast %cst_67 : f32 to vector<4x8x8xf32>
    %111 = arith.select %109, %110, %106 : vector<4x8x8xi1>, vector<4x8x8xf32>
    %cst_68 = arith.constant dense<0xFF800000> : vector<4x8xf32>
    %112 = vector.multi_reduction <maximumf>, %111, %cst_68 [2] : vector<4x8x8xf32> to vector<4x8xf32>
    %113 = vector.shape_cast %112 : vector<4x8xf32> to vector<4x8x1xf32>
    %114 = vector.broadcast %113 : vector<4x8x1xf32> to vector<4x8x8xf32>
    %115 = arith.subf %111, %114 : vector<4x8x8xf32>
    %116 = math.exp %115 : vector<4x8x8xf32>
    %cst_69 = arith.constant dense<0.000000e+00> : vector<4x8xf32>
    %117 = vector.multi_reduction <add>, %116, %cst_69 [2] : vector<4x8x8xf32> to vector<4x8xf32>
    %118 = vector.shape_cast %117 : vector<4x8xf32> to vector<4x8x1xf32>
    %119 = tpu.reciprocal %118 {approx = true} : vector<4x8x1xf32> -> vector<4x8x1xf32>
    %120 = vector.broadcast %119 : vector<4x8x1xf32> to vector<4x8x8xf32>
    %121 = arith.mulf %116, %120 : vector<4x8x8xf32>
    %122 = arith.truncf %121 : vector<4x8x8xf32> to vector<4x8x8xbf16>
    "tpu.trace_start"() <{level = 10 : i32, message = "hqk,hkd->hqd"}> : () -> ()
    %cst_70 = arith.constant dense<0.000000e+00> : vector<4x8x8xf32>
    %123 = tpu.matmul %122, %104, %cst_70 {dimension_numbers = #tpu.dot_dimension_numbers<[2], [1], [1], [2], [0, 0, 0, 1, 1, 2], [0], [0]>} : vector<4x8x8xbf16>, vector<4x8x8xbf16>, vector<4x8x8xf32> -> vector<4x8x8xf32>
    "tpu.trace_stop"() : () -> ()
    %124 = vector.extract_strided_slice %123 {offsets = [0, 0, 0], sizes = [1, 8, 8], strides = [1, 1, 1]} : vector<4x8x8xf32> to vector<1x8x8xf32>
    %125 = vector.shape_cast %124 : vector<1x8x8xf32> to vector<8x8xf32>
    %126 = arith.truncf %125 : vector<8x8xf32> to vector<8x8xbf16>
    %c0_71 = arith.constant 0 : index
    %c0_72 = arith.constant 0 : index
    %127 = vector.load %arg20[%c0_71, %c0_72] : memref<8x32xbf16, #tpu.memory_space<vmem>>, vector<8x8xbf16>
    tpu.vector_store %arg20[%c0_71, %c0_72], %126 {strides = array<i32>} : memref<8x32xbf16, #tpu.memory_space<vmem>>, vector<8x8xbf16>,
    %128 = vector.extract_strided_slice %123 {offsets = [1, 0, 0], sizes = [1, 8, 8], strides = [1, 1, 1]} : vector<4x8x8xf32> to vector<1x8x8xf32>
    %129 = vector.shape_cast %128 : vector<1x8x8xf32> to vector<8x8xf32>
    %130 = arith.truncf %129 : vector<8x8xf32> to vector<8x8xbf16>
    %c0_73 = arith.constant 0 : index
    %c8 = arith.constant 8 : index
    %131 = vector.load %arg20[%c0_73, %c8] : memref<8x32xbf16, #tpu.memory_space<vmem>>, vector<8x8xbf16>
    tpu.vector_store %arg20[%c0_73, %c8], %130 {strides = array<i32>} : memref<8x32xbf16, #tpu.memory_space<vmem>>, vector<8x8xbf16>,
    %132 = vector.extract_strided_slice %123 {offsets = [2, 0, 0], sizes = [1, 8, 8], strides = [1, 1, 1]} : vector<4x8x8xf32> to vector<1x8x8xf32>
    %133 = vector.shape_cast %132 : vector<1x8x8xf32> to vector<8x8xf32>
    %134 = arith.truncf %133 : vector<8x8xf32> to vector<8x8xbf16>
    %c0_74 = arith.constant 0 : index
    %c16 = arith.constant 16 : index
    %135 = vector.load %arg20[%c0_74, %c16] : memref<8x32xbf16, #tpu.memory_space<vmem>>, vector<8x8xbf16>
    tpu.vector_store %arg20[%c0_74, %c16], %134 {strides = array<i32>} : memref<8x32xbf16, #tpu.memory_space<vmem>>, vector<8x8xbf16>,
    %136 = vector.extract_strided_slice %123 {offsets = [3, 0, 0], sizes = [1, 8, 8], strides = [1, 1, 1]} : vector<4x8x8xf32> to vector<1x8x8xf32>
    %137 = vector.shape_cast %136 : vector<1x8x8xf32> to vector<8x8xf32>
    %138 = arith.truncf %137 : vector<8x8xf32> to vector<8x8xbf16>
    %c0_75 = arith.constant 0 : index
    %c24 = arith.constant 24 : index
    %139 = vector.load %arg20[%c0_75, %c24] : memref<8x32xbf16, #tpu.memory_space<vmem>>, vector<8x8xbf16>
    tpu.vector_store %arg20[%c0_75, %c24], %138 {strides = array<i32>} : memref<8x32xbf16, #tpu.memory_space<vmem>>, vector<8x8xbf16>,
    %c0_76 = arith.constant 0 : index
    %c0_77 = arith.constant 0 : index
    %140 = vector.load %arg20[%c0_76, %c0_77] : memref<8x32xbf16, #tpu.memory_space<vmem>>, vector<8x32xbf16>
    %c0_78 = arith.constant 0 : index
    %c0_79 = arith.constant 0 : index
    %c0_80 = arith.constant 0 : index
    %141 = vector.load %arg8[%c0_78, %c0_79, %c0_80] : memref<1x32x32xbf16, #tpu.memory_space<vmem>>, vector<1x32x32xbf16>
    %142 = vector.shape_cast %141 : vector<1x32x32xbf16> to vector<32x32xbf16>
    %cst_81 = arith.constant dense<0.000000e+00> : vector<8x32xf32>
    %143 = tpu.matmul %140, %142, %cst_81 {dimension_numbers = #tpu.dot_dimension_numbers<[1], [0], [0], [1], [0, 0, 1, 1], [], []>} : vector<8x32xbf16>, vector<32x32xbf16>, vector<8x32xf32> -> vector<8x32xf32>
    %c0_82 = arith.constant 0 : index
    %c0_83 = arith.constant 0 : index
    %c0_84 = arith.constant 0 : index
    %144 = vector.load %arg9[%c0_82, %c0_83, %c0_84] : memref<1x1x32xf32, #tpu.memory_space<vmem>>, vector<1x1x32xf32>
    %145 = vector.shape_cast %144 : vector<1x1x32xf32> to vector<1x32xf32>
    %146 = vector.broadcast %145 : vector<1x32xf32> to vector<8x32xf32>
    %147 = arith.addf %143, %146 : vector<8x32xf32>
    %148 = arith.addf %4, %147 : vector<8x32xf32>
    %c0_85 = arith.constant 0 : index
    %c0_86 = arith.constant 0 : index
    %c0_87 = arith.constant 0 : index
    %149 = vector.load %arg10[%c0_85, %c0_86, %c0_87] : memref<1x1x32xf32, #tpu.memory_space<vmem>>, vector<1x1x32xf32>
    %150 = vector.shape_cast %149 : vector<1x1x32xf32> to vector<1x32xf32>
    %c0_88 = arith.constant 0 : index
    %c0_89 = arith.constant 0 : index
    %c0_90 = arith.constant 0 : index
    %151 = vector.load %arg11[%c0_88, %c0_89, %c0_90] : memref<1x1x32xf32, #tpu.memory_space<vmem>>, vector<1x1x32xf32>
    %152 = vector.shape_cast %151 : vector<1x1x32xf32> to vector<1x32xf32>
    %cst_91 = arith.constant dense<0.000000e+00> : vector<8xf32>
    %153 = vector.multi_reduction <add>, %148, %cst_91 [1] : vector<8x32xf32> to vector<8xf32>
    %154 = vector.shape_cast %153 : vector<8xf32> to vector<8x1xf32>
    %cst_92 = arith.constant 3.200000e+01 : f32
    %155 = vector.broadcast %cst_92 : f32 to vector<8x1xf32>
    %156 = arith.divf %154, %155 : vector<8x1xf32>
    %157 = vector.broadcast %156 : vector<8x1xf32> to vector<8x32xf32>
    %158 = arith.subf %148, %157 : vector<8x32xf32>
    %159 = arith.mulf %158, %158 : vector<8x32xf32>
    %cst_93 = arith.constant dense<0.000000e+00> : vector<8xf32>
    %160 = vector.multi_reduction <add>, %159, %cst_93 [1] : vector<8x32xf32> to vector<8xf32>
    %161 = vector.shape_cast %160 : vector<8xf32> to vector<8x1xf32>
    %cst_94 = arith.constant 3.100000e+01 : f32
    %162 = vector.broadcast %cst_94 : f32 to vector<8x1xf32>
    %163 = arith.divf %161, %162 : vector<8x1xf32>
    %164 = vector.broadcast %156 : vector<8x1xf32> to vector<8x32xf32>
    %165 = arith.subf %148, %164 : vector<8x32xf32>
    %166 = vector.broadcast %150 : vector<1x32xf32> to vector<8x32xf32>
    %167 = arith.mulf %166, %165 : vector<8x32xf32>
    %168 = math.sqrt %163 : vector<8x1xf32>
    %cst_95 = arith.constant 9.99999997E-7 : f32
    %169 = vector.broadcast %cst_95 : f32 to vector<8x1xf32>
    %170 = arith.addf %168, %169 : vector<8x1xf32>
    %171 = vector.broadcast %170 : vector<8x1xf32> to vector<8x32xf32>
    %172 = arith.divf %167, %171 : vector<8x32xf32>
    %173 = vector.broadcast %152 : vector<1x32xf32> to vector<8x32xf32>
    %174 = arith.addf %172, %173 : vector<8x32xf32>
    %175 = arith.truncf %174 : vector<8x32xf32> to vector<8x32xbf16>
    %cst_96 = arith.constant 0.000000e+00 : f32
    %176 = vector.broadcast %cst_96 : f32 to vector<8x32xf32>
    %c0_97 = arith.constant 0 : index
    %c0_98 = arith.constant 0 : index
    %c0_99 = arith.constant 0 : index
    %177 = vector.load %arg12[%c0_97, %c0_98, %c0_99] : memref<1x32x128xbf16, #tpu.memory_space<vmem>>, vector<1x32x128xbf16>
    %178 = vector.shape_cast %177 : vector<1x32x128xbf16> to vector<32x128xbf16>
    %cst_100 = arith.constant dense<0.000000e+00> : vector<8x128xf32>
    %179 = tpu.matmul %175, %178, %cst_100 {dimension_numbers = #tpu.dot_dimension_numbers<[1], [0], [0], [1], [0, 0, 1, 1], [], []>} : vector<8x32xbf16>, vector<32x128xbf16>, vector<8x128xf32> -> vector<8x128xf32>
    %c0_101 = arith.constant 0 : index
    %c0_102 = arith.constant 0 : index
    %c0_103 = arith.constant 0 : index
    %180 = vector.load %arg13[%c0_101, %c0_102, %c0_103] : memref<1x1x128xf32, #tpu.memory_space<vmem>>, vector<1x1x128xf32>
    %181 = vector.shape_cast %180 : vector<1x1x128xf32> to vector<1x128xf32>
    %182 = vector.broadcast %181 : vector<1x128xf32> to vector<8x128xf32>
    %183 = arith.addf %179, %182 : vector<8x128xf32>
    %cst_104 = arith.constant 5.000000e-01 : f32
    %184 = vector.broadcast %cst_104 : f32 to vector<8x128xf32>
    %185 = arith.mulf %184, %183 : vector<8x128xf32>
    %186 = arith.mulf %183, %183 : vector<8x128xf32>
    %187 = arith.mulf %183, %186 : vector<8x128xf32>
    %cst_105 = arith.constant 4.471500e-02 : f32
    %188 = vector.broadcast %cst_105 : f32 to vector<8x128xf32>
    %189 = arith.mulf %188, %187 : vector<8x128xf32>
    %190 = arith.addf %183, %189 : vector<8x128xf32>
    %cst_106 = arith.constant 0.797884583 : f32
    %191 = vector.broadcast %cst_106 : f32 to vector<8x128xf32>
    %192 = arith.mulf %191, %190 : vector<8x128xf32>
    %193 = math.tanh %192 : vector<8x128xf32>
    %cst_107 = arith.constant 1.000000e+00 : f32
    %194 = vector.broadcast %cst_107 : f32 to vector<8x128xf32>
    %195 = arith.addf %194, %193 : vector<8x128xf32>
    %196 = arith.mulf %185, %195 : vector<8x128xf32>
    %197 = arith.truncf %196 : vector<8x128xf32> to vector<8x128xbf16>
    %c0_108 = arith.constant 0 : index
    %c0_109 = arith.constant 0 : index
    %c0_110 = arith.constant 0 : index
    %198 = vector.load %arg14[%c0_108, %c0_109, %c0_110] : memref<1x128x32xbf16, #tpu.memory_space<vmem>>, vector<1x128x32xbf16>
    %199 = vector.shape_cast %198 : vector<1x128x32xbf16> to vector<128x32xbf16>
    %cst_111 = arith.constant dense<0.000000e+00> : vector<8x32xf32>
    %200 = tpu.matmul %197, %199, %cst_111 {dimension_numbers = #tpu.dot_dimension_numbers<[1], [0], [0], [1], [0, 0, 1, 1], [], []>} : vector<8x128xbf16>, vector<128x32xbf16>, vector<8x32xf32> -> vector<8x32xf32>
    %201 = arith.addf %176, %200 : vector<8x32xf32>
    %202 = arith.addf %148, %201 : vector<8x32xf32>
    %c0_112 = arith.constant 0 : index
    %c0_113 = arith.constant 0 : index
    %c0_114 = arith.constant 0 : index
    %203 = vector.load %arg15[%c0_112, %c0_113, %c0_114] : memref<1x1x32xf32, #tpu.memory_space<vmem>>, vector<1x1x32xf32>
    %204 = vector.shape_cast %203 : vector<1x1x32xf32> to vector<1x32xf32>
    %205 = vector.broadcast %204 : vector<1x32xf32> to vector<8x32xf32>
    %206 = arith.addf %202, %205 : vector<8x32xf32>
    %c0_115 = arith.constant 0 : index
    %c0_116 = arith.constant 0 : index
    %c0_117 = arith.constant 0 : index
    %207 = vector.load %arg16[%c0_115, %c0_116, %c0_117] : memref<1x8x32xf32, #tpu.memory_space<vmem>>, vector<1x8x32xf32>
    %208 = vector.shape_cast %207 : vector<1x8x32xf32> to vector<8x32xf32>
    %209 = vector.shape_cast %206 : vector<8x32xf32> to vector<1x8x32xf32>
    tpu.vector_store %arg16[%c0_115, %c0_116, %c0_117], %209 {strides = array<i32>} : memref<1x8x32xf32, #tpu.memory_space<vmem>>, vector<1x8x32xf32>,
    return
  }
  func.func @transform_0(%arg0: i32, %arg1: i32) -> (i32, i32, i32) {
    %c0_i32 = arith.constant 0 : i32
    %c0_i32_0 = arith.constant 0 : i32
    %c0_i32_1 = arith.constant 0 : i32
    return %arg0, %c0_i32, %c0_i32_0 : i32, i32, i32
  }
  func.func @transform_1(%arg0: i32, %arg1: i32) -> (i32, i32, i32) {
    %c0_i32 = arith.constant 0 : i32
    %c0_i32_0 = arith.constant 0 : i32
    %c0_i32_1 = arith.constant 0 : i32
    return %arg0, %c0_i32, %c0_i32_0 : i32, i32, i32
  }
  func.func @transform_2(%arg0: i32, %arg1: i32) -> (i32, i32, i32) {
    %c0_i32 = arith.constant 0 : i32
    %c0_i32_0 = arith.constant 0 : i32
    %c0_i32_1 = arith.constant 0 : i32
    return %arg1, %c0_i32, %c0_i32_0 : i32, i32, i32
  }
  func.func @transform_3(%arg0: i32, %arg1: i32) -> (i32, i32, i32) {
    %c0_i32 = arith.constant 0 : i32
    %c0_i32_0 = arith.constant 0 : i32
    %c0_i32_1 = arith.constant 0 : i32
    return %arg1, %c0_i32, %c0_i32_0 : i32, i32, i32
  }
  func.func @transform_4(%arg0: i32, %arg1: i32) -> (i32, i32, i32) {
    %c0_i32 = arith.constant 0 : i32
    %c0_i32_0 = arith.constant 0 : i32
    %c0_i32_1 = arith.constant 0 : i32
    return %arg1, %c0_i32, %c0_i32_0 : i32, i32, i32
  }
  func.func @transform_5(%arg0: i32, %arg1: i32) -> (i32, i32, i32) {
    %c0_i32 = arith.constant 0 : i32
    %c0_i32_0 = arith.constant 0 : i32
    %c0_i32_1 = arith.constant 0 : i32
    return %arg1, %c0_i32, %c0_i32_0 : i32, i32, i32
  }
  func.func @transform_6(%arg0: i32, %arg1: i32) -> (i32, i32, i32) {
    %c0_i32 = arith.constant 0 : i32
    %c0_i32_0 = arith.constant 0 : i32
    %c0_i32_1 = arith.constant 0 : i32
    return %arg1, %c0_i32, %c0_i32_0 : i32, i32, i32
  }
  func.func @transform_7(%arg0: i32, %arg1: i32) -> (i32, i32, i32) {
    %c0_i32 = arith.constant 0 : i32
    %c0_i32_0 = arith.constant 0 : i32
    %c0_i32_1 = arith.constant 0 : i32
    return %arg1, %c0_i32, %c0_i32_0 : i32, i32, i32
  }
  func.func @transform_8(%arg0: i32, %arg1: i32) -> (i32, i32, i32) {
    %c0_i32 = arith.constant 0 : i32
    %c0_i32_0 = arith.constant 0 : i32
    %c0_i32_1 = arith.constant 0 : i32
    return %arg1, %c0_i32, %c0_i32_0 : i32, i32, i32
  }
  func.func @transform_9(%arg0: i32, %arg1: i32) -> (i32, i32, i32) {
    %c0_i32 = arith.constant 0 : i32
    %c0_i32_0 = arith.constant 0 : i32
    %c0_i32_1 = arith.constant 0 : i32
    return %arg1, %c0_i32, %c0_i32_0 : i32, i32, i32
  }
  func.func @transform_10(%arg0: i32, %arg1: i32) -> (i32, i32, i32) {
    %c0_i32 = arith.constant 0 : i32
    %c0_i32_0 = arith.constant 0 : i32
    %c0_i32_1 = arith.constant 0 : i32
    return %arg1, %c0_i32, %c0_i32_0 : i32, i32, i32
  }
  func.func @transform_11(%arg0: i32, %arg1: i32) -> (i32, i32, i32) {
    %c0_i32 = arith.constant 0 : i32
    %c0_i32_0 = arith.constant 0 : i32
    %c0_i32_1 = arith.constant 0 : i32
    return %arg1, %c0_i32, %c0_i32_0 : i32, i32, i32
  }
  func.func @transform_12(%arg0: i32, %arg1: i32) -> (i32, i32, i32) {
    %c0_i32 = arith.constant 0 : i32
    %c0_i32_0 = arith.constant 0 : i32
    %c0_i32_1 = arith.constant 0 : i32
    return %arg1, %c0_i32, %c0_i32_0 : i32, i32, i32
  }
  func.func @transform_13(%arg0: i32, %arg1: i32) -> (i32, i32, i32) {
    %c0_i32 = arith.constant 0 : i32
    %c0_i32_0 = arith.constant 0 : i32
    %c0_i32_1 = arith.constant 0 : i32
    return %arg1, %c0_i32, %c0_i32_0 : i32, i32, i32
  }
  func.func @transform_14(%arg0: i32, %arg1: i32) -> (i32, i32, i32) {
    %c0_i32 = arith.constant 0 : i32
    %c0_i32_0 = arith.constant 0 : i32
    %c0_i32_1 = arith.constant 0 : i32
    return %arg0, %c0_i32, %c0_i32_0 : i32, i32, i32
  }
}

</mosaic_0001>

<bundles_post_ra>
// kernel: tpu_custom_call.1
= control target key start
LH: loop header
LB: loop body
LE: loop exit
PB: predicated region body
PF: predicated region fallthrough
CT: control target
= control target key end

     0   :  { %s2273_s0 = inlined_call_operand.vmem [shape: f32[2,8,32], index: 0, kind: input, shape index: {}]   ;;  %s2274_s1 = inlined_call_operand.vmem [shape: f32[2,1,8], index: 1, kind: input, shape index: {}]   ;;  %s2275_s2 = inlined_call_operand.vmem [shape: f32[2,1,32], index: 2, kind: input, shape index: {}]   ;;  %s2276_s3 = inlined_call_operand.vmem [shape: f32[2,1,32], index: 3, kind: input, shape index: {}]   ;;  %s2277_s4 = inlined_call_operand.vmem [shape: bf16[2,32,96], index: 4, kind: input, shape index: {}]   ;;  %s2278_s5 = inlined_call_operand.vmem [shape: f32[2,1,96], index: 5, kind: input, shape index: {}]   ;;  %s2279_s6 = inlined_call_operand.vmem [shape: bf16[2,32,32], index: 6, kind: input, shape index: {}]   ;;  %s2280_s7 = inlined_call_operand.vmem [shape: f32[2,1,32], index: 7, kind: input, shape index: {}]   ;;  %s2281_s8 = inlined_call_operand.vmem [shape: f32[2,1,32], index: 8, kind: input, shape index: {}]   ;;  %s2282_s9 = inlined_call_operand.vmem [shape: f32[2,1,32], index: 9, kind: input, shape index: {}]   ;;  %s2283_s10 = inlined_call_operand.vmem [shape: bf16[2,32,128], index: 10, kind: input, shape index: {}]   ;;  %s2284_s11 = inlined_call_operand.vmem [shape: f32[2,1,128], index: 11, kind: input, shape index: {}]   ;;  %s2285_s12 = inlined_call_operand.vmem [shape: bf16[2,128,32], index: 12, kind: input, shape index: {}]   ;;  %s2286_s13 = inlined_call_operand.vmem [shape: f32[2,1,32], index: 13, kind: input, shape index: {}]   ;;  %s2287_s14 = inlined_call_operand.hbm [shape: f32[2,8,32], index: 14, kind: output, shape index: {}]  }
   0x1   :  { %2304 = sst [smem:[#allocation23_spill]] %s2273_s0 }
   0x2   :  { %2305 = sst [smem:[#allocation24_spill]] %s2277_s4 }
   0x3   :  { %2306 = sst [smem:[#allocation25_spill]] %s2279_s6 }
   0x4   :  { %2307 = sst [smem:[#allocation26_spill]] %s2280_s7 }
   0x5   :  { %2308 = sst [smem:[#allocation27_spill]] %s2281_s8 }
   0x6   :  { %2309 = sst [smem:[#allocation28_spill]] %s2284_s11 }
   0x7   :  { %2310 = sst [smem:[#allocation29_spill]] %s2285_s12 }
   0x8   :  { %2311 = sst [smem:[#allocation30_spill]] %s2286_s13 }
   0x9   :  { %2312 = sst [smem:[#allocation31_spill]] %s2287_s14 }
   0xa   :  { %19 = vsyncpa [#allocation7], 0 }
   0xb   :  { %21 = vsyncpa [#allocation7 + $0x1], 0  ;;  %s1944_s29 = smov 0   ;;  %s1946_s30 = smov 0  }
   0xc   :  { %s1948_s15 = smov 0   ;;  %s1950_s16 = smov 0  }
   0xd   :  { %s1952_s17 = smov 0   ;;  %s1954_s18 = smov 0  }
   0xe   :  { %s1956_s19 = smov 0   ;;  %s1958_s20 = smov 0  }
   0xf LB: > { %2313 = sst [smem:[#allocation9_spill]] %s1822_s29  ;;  %s1525_s21 = sadd.s32 4294967295, %s1850_s20   ;;  %s1850_s20 = sphi %s1958_s20, %s27_s20   ;;  %s1846_s19 = sphi %s1956_s19, %s2363_s19   ;;  %s1842_s18 = sphi %s1954_s18, %s2362_s18   ;;  %s1838_s17 = sphi %s1952_s17, %s2361_s17   ;;  %s1834_s16 = sphi %s1950_s16, %s2360_s16   ;;  %s1830_s15 = sphi %s1948_s15, %s2359_s15   ;;  %s1826_s30 = sphi %s1946_s30, %s2358_s30   ;;  %s1822_s29 = sphi %s1944_s29, %s2357_s29  }
  0x10   : > { %2314 = sst [smem:[#allocation10_spill]] %s1826_s30  ;;  %s1526_s22 = sadd.s32 4294967294, %s1850_s20  }
  0x11   : > { %2315 = sst [smem:[#allocation11_spill]] %s1830_s15  ;;  %s36_s23 = sadd.s32 1, %s1842_s18 }
  0x12   : > { %2316 = sst [smem:[#allocation12_spill]] %s1834_s16  ;;  %p37_p0 = scmp.ge.s32.totalorder %s36_s23, 2 }
  0x13   : > { %2317 = sst [smem:[#allocation13_spill]] %s1838_s17  ;;  %s39_s24 = sadd.s32 1, %s1846_s19 }
  0x14   : > { %2318 = sst [smem:[#allocation14_spill]] %s1842_s18  ;;  %p420_p1 = scmp.ne.s32.totalorder %s1830_s15, %s1826_s30 }
  0x15   : > { %2319 = sst [smem:[#allocation15_spill]] %s1846_s19  ;;  %p421_p2 = scmp.eq.s32.totalorder %s1525_s21, 3 }
  0x16   : > { %2320 = sst [smem:[#allocation16_spill]] %s1850_s20  ;;  %s2365_s23 = smov (%p37_p0, %s36_s23), 0 }
  0x17   : > { %2321 = sst [smem:[#allocation17_spill]] %s2365_s23  ;;  %s2367_s24 = smov (!%p37_p0, %s39_s24), %s1846_s19 }
  0x18   : > { %p1993_p3 = por %p421_p2, %p420_p1  ;;  %p426_p4 = scmp.ne.s32.totalorder %s1826_s30, %s1822_s29 }
  0x19   : > { %p41_p5 = scmp.ge.s32.totalorder %s2367_s24, 2  ;;  %p427_p6 = scmp.eq.s32.totalorder %s1526_s22, 3 }
  0x1a   : > { %s2322_s25 = scalar_select %p1993_p3, 1, 0 }
  0x1b   : > { %p1529_p7 = scmp.ge.s32.totalorder %s1850_s20, 1  ;;  %p538_p8 = scmp.lt.s32.totalorder %s1850_s20, 5 }
  0x1c   : > { %2323 = sst [smem:[#allocation18_spill]] %s2322_s25  ;;  %s2369_s24 = smov (%p41_p5, %s2367_s24), 0 }
  0x1d   : > { %2324 = sst [smem:[#allocation19_spill]] %s2369_s24  ;;  %p2003_p9 = por %p427_p6, %p426_p4 }
  0x1e   : > { %p539_p10 = pnand %p1529_p7, %p538_p8  ;;  %s407_s27 = ssub.s32 %s1846_s19, %s2369_s24 }
  0x1f   : > { %s2325_s26 = scalar_select %p2003_p9, 1, 0 }
  0x20   : > { %s410_s28 = sadd.s32 1, %s1830_s15  ;;  %p408_p11 = scmp.eq.s32.totalorder %s407_s27, 0 }
  0x21   : > { %2326 = sst [smem:[#allocation20_spill]] %s2325_s26  ;;  %542 = sbr.rel (%p539_p10) target bundleno = 1974 (0x7b6), region = 76 }
  0x22   : > { %s2011_s21 = scalar_select %p408_p11, %s1830_s15, %s410_s28  }
  0x24   : > { %2327 = sst [smem:[#allocation21_spill]] %s2011_s21 }
  0x26   : > { %s2290_s22 = sand.u32 1, %s1826_s30   ;;  %p630_p12 = scmp.lt.s32.totalorder %s1838_s17, 1 }
  0x27   : > { %s1530_s23 = sshll.u32 %s2290_s22, 3  ;;  %p637_p13 = scmp.lt.s32.totalorder %s1834_s16, 1 }
  0x28   : > { %s2019_s18 = scalar_select %p630_p12, %s1838_s17, 1 }
  0x29   : > { %s2022_s24 = scalar_select %p637_p13, %s1834_s16, 1 }
  0x2a   : > { %s1531_s27 = sshll.u32 %s2019_s18, 3  ;;  %s2328_s0 = sld [smem:[#allocation23_spill]] }
  0x2b   : > { %s1612_s16 = sshll.u32 %s2022_s24, 4  ;;  %s2329_s4 = sld [smem:[#allocation24_spill]] }
  0x2c   : > { %s2330_s6 = sld [smem:[#allocation25_spill]]  ;;  %s2070_s28 = scalar_lea.vmem %s2283_s10, %s1612_s16 }
  0x2d   : > { %s2334_s19 = sld [smem:[#allocation28_spill]]  ;;  %s2086_s12 = scalar_lea.vmem [#allocation6], %s1530_s23 }
  0x2e   : > { %s2335_s14 = sld [smem:[#allocation30_spill]] }
  0x2f   : > { %s2336_s25 = sld [smem:[#allocation29_spill]] }
  0x30   : > { %s633_s26 = scalar_lea.vmem %s2328_s0, %s1531_s27  ;;  %s664_s0 = scalar_lea.vmem %s2282_s9, %s2022_s24 }
  0x31   : > { %s2044_s11 = scalar_lea.vmem %s2329_s4, %s1612_s16  ;;  %s2337_s13 = sld [smem:[#allocation12_spill]] }
  0x32   : > { %s2053_s27 = scalar_lea.vmem %s2330_s6, %s1612_s16 }
  0x33   : > { %2331 = sst [smem:[#allocation22_spill]] %s2053_s27  ;;  %s672_s6 = scalar_lea.vmem %s2334_s19, %s2022_s24 }
  0x34   : > { %s1615_s27 = sshll.u32 %s2022_s24, 6  ;;  %s680_s7 = scalar_lea.vmem %s2335_s14, %s2022_s24 }
  0x35   : > { %s2084_s8 = scalar_lea.vmem %s2336_s25, %s1615_s27 }
  0x37   : > { %p1540_p0 = scmp.ne.s32.totalorder %s2337_s13, 0 }
  0x39   : > { %685 = sbr.rel (%p1540_p0) target bundleno = 64 (0x40), region = 80 }
  0x3e   : > { %v686_v0 = vld [vmem:[%s633_s26] sm:$0xff]  ;;  %vm687_vm0 = vcmask 261120  }
  0x3f   : > { %688 = vst.msk [vmem:[%s2086_s12] sm:$0xff] %vm687_vm0, %v686_v0 }
  0x40 PF: > { %vm694_vm1 = vcmask 261120   ;;  %v1852_v3 = vmov 32.0   ;;  %v1853_v15 = vmov 31.0   ;;  %v1617_v20 = vld [vmem:[%s2044_s11 + $0x8] sm:$0xff]  ;;  %v1616_v21 = vld [vmem:[%s2044_s11] sm:$0xff]  ;;  %s2338_s16 = scalar_lea.vmem %s2275_s2, %s2022_s24  ;;  %s2339_s25 = scalar_lea.vmem %s2276_s3, %s2022_s24  ;;  %vm793_vm10 = vcmask 60416  }
  0x41   : > { %1726 = vrcp.f32 %v1852_v3  ;;  %785 = vmatpush.bf16.msra.mxu0 %v1617_v20  ;;  %v1718_v41 = vld [vmem:[%s2338_s16] ss:$0 sm:$0xff]  ;;  %s2340_s14 = scalar_lea.vmem %s2278_s5, %s2022_s24  ;;  %s1854_s22 = smov 72   ;;  %vm861_vm11 = vcmask 64512   ;;  %vm996_vm14 = vcmask 1043456   ;;  %vm1077_vm15 = vcmask 126016  }
  0x42   : > { %1728 = vrcp.f32 %v1853_v15  ;;  %v1719_v48 = vld [vmem:[%s2339_s25] ss:$0 sm:$0xff]  ;;  %s1855_s15 = smov 120   ;;  %s1856_s21 = smov 88   ;;  %vm1084_vm0 = vcmask 191616  }
  0x43   : > { %v1720_v53 = vld [vmem:[%s2340_s14] ss:$0 sm:$0xff]  ;;  %s1857_s29 = smov 112   ;;  %s1858_s20 = smov 80  }
  0x44   : > { %s1859_s17 = smov 96   ;;  %s1860_s30 = smov 104  }
  0x45   : > { %786 = vmatpush.bf16.msra.mxu0 %v1616_v21  ;;  %s2341_s11 = scalar_lea.vmem %s2274_s1, %s2019_s18  ;;  %s1862_s18 = smov 48  }
  0x46   : > { %v2091_v1 = vld [vmem:[%s2086_s12] sm:$0xff]  ;;  %s1863_s16 = smov 56   ;;  %s1864_s19 = smov 64  }
  0x47   : > { %v695_v2 = vsel %vm694_vm1, %v2091_v1, 0.0  ;;  %v1727_v4 = vpop.eup %1726  ;;  %s1865_s23 = smov 40   ;;  %s1866_s25 = smov 8  }
  0x48   : > { %696 = vadd.xlane.f32.xlu0 %v695_v2  ;;  %v699_v5 = vmul.f32 32.0, %v1727_v4  ;;  %vm703_vm2 = vweird.f32 %v1727_v4  ;;  %v1729_v16 = vpop.eup %1728  ;;  %s2342_s26 = sld [smem:[#allocation22_spill]]  ;;  %s1867_s27 = smov 16  }
  0x49   : > { %v712_v17 = vmul.f32 31.0, %v1729_v16  ;;  %vm716_vm3 = vweird.f32 %v1729_v16  ;;  %s1868_s14 = smov 24  }
  0x4a   : > { %v700_v6 = vsub.f32 1.0, %v699_v5 }
  0x4b   : > { %v713_v18 = vsub.f32 1.0, %v712_v17  ;;  %v1861_v17 = vmov 0  }
  0x4c   : > { %v701_v7 = vmul.f32 %v1727_v4, %v700_v6 }
  0x4d   : > { %v714_v19 = vmul.f32 %v1729_v16, %v713_v18 }
  0x4e   : > { %v702_v8 = vadd.f32 %v1727_v4, %v701_v7 }
  0x4f   : > { %v715_v22 = vadd.f32 %v1729_v16, %v714_v19 }
  0x50   : > { %v2095_v9 = vsel %vm703_vm2, %v1727_v4, %v702_v8  ;;  %vm1091_vm2 = vcmask 257216  }
  0x51   : > { %v2102_v23 = vsel %vm716_vm3, %v1729_v16, %v715_v22  ;;  %v690_v16 = vld [vmem:[%s2341_s11] sm:$0x1] }
  0x52   : > { %vm691_vm12 = vcmp.gt.f32.partialorder %v690_v16, 0.5 }
  0x53   : > { %v938_v18 = vsel %vm691_vm12, 1, %v1861_v17 }
  0x54   : > { %v939_v20 = vperm.slane %v938_v18, 0 }
  0x56   : > { %vm940_vm13 = vcmp.eq.s32.totalorder %v939_v20, 1 }
  0xbb   : > { %v697_v10 = vpop.xlane.xlu0 %696 }
  0xbc   : > { %v705_v11 = vmul.f32 %v2095_v9, %v697_v10 }
  0xbe   : > { %v706_v12 = vsub.f32 %v2091_v1, %v705_v11 }
  0xc0   : > { %v707_v13 = vmul.f32 %v706_v12, %v706_v12  ;;  %v722_v46 = vmul.f32 %v1718_v41, %v706_v12 }
  0xc2   : > { %v708_v14 = vsel %vm694_vm1, %v707_v13, 0.0 }
  0xc3   : > { %709 = vadd.xlane.f32.xlu0 %v708_v14 }
 0x136   : > { %v710_v24 = vpop.xlane.xlu0 %709 }
 0x137   : > { %v718_v25 = vmul.f32 %v2102_v23, %v710_v24 }
 0x139   : > { %1730 = vrsqrt.f32 %v718_v25  ;;  %vm730_vm4 = vcmp.eq.f32.partialorder %v718_v25, inf  ;;  %v733_v33 = vand.u32 2147483648, %v718_v25  ;;  %vm732_vm5 = vcmp.eq.f32.partialorder %v718_v25, 0.0 }
 0x13f   : > { %v1731_v26 = vpop.eup %1730 }
 0x140   : > { %v724_v27 = vmul.f32 %v1731_v26, %v718_v25 }
 0x142   : > { %v725_v28 = vmul.f32 %v1731_v26, %v724_v27 }
 0x144   : > { %v726_v29 = vmul.f32 0.5, %v725_v28 }
 0x146   : > { %v727_v30 = vsub.f32 1.5, %v726_v29 }
 0x148   : > { %v728_v31 = vmul.f32 %v1731_v26, %v727_v30 }
 0x14a   : > { %v729_v32 = vmul.f32 %v728_v31, %v718_v25 }
 0x14c   : > { %v731_v34 = vsel %vm730_vm4, %v718_v25, %v729_v32 }
 0x14d   : > { %v734_v35 = vsel %vm732_vm5, %v733_v33, %v731_v34 }
 0x14e   : > { %v735_v36 = vadd.f32 1e-06, %v734_v35 }
 0x150   : > { %1732 = vrcp.f32 %v735_v36  ;;  %v747_v40 = vand.u32 2147483648, %v735_v36  ;;  %v745_v43 = vand.u32 2147483647, %v735_v36  ;;  %vm741_vm7 = vweird.f32 %v735_v36 }
 0x152   : > { %v748_v45 = vor.u32 1.1754944e-38, %v747_v40  ;;  %vm746_vm9 = vcmp.eq.f32.partialorder %v745_v43, 8.507059e+37 }
 0x156   : > { %v1733_v37 = vpop.eup %1732 }
 0x157   : > { %v737_v38 = vmul.f32 %v1733_v37, %v735_v36  ;;  %vm742_vm6 = vweird.f32 %v1733_v37 }
 0x158   : > { %vm743_vm8 = vmor %vm741_vm7, %vm742_vm6 }
 0x159   : > { %v738_v39 = vsub.f32 1.0, %v737_v38 }
 0x15b   : > { %v739_v42 = vmul.f32 %v1733_v37, %v738_v39 }
 0x15d   : > { %v740_v44 = vadd.f32 %v1733_v37, %v739_v42 }
 0x15f   : > { %v744_v47 = vsel %vm743_vm8, %v1733_v37, %v740_v44 }
 0x160   : > { %v749_v49 = vsel %vm746_vm9, %v748_v45, %v744_v47 }
 0x161   : > { %v750_v50 = vmul.f32 %v749_v49, %v722_v46 }
 0x163   : > { %v754_v51 = vadd.f32 %v1719_v48, %v750_v50 }
 0x165   : > { %v755_v52 = vpack.c.bf16 %v754_v51, %v754_v51 }
 0x167   : > { %1549 = vmatmul.msk.bf16.vlgmr.msra.gmra.mxu0 %vm694_vm1, %v755_v52 }
 0x1e4   : > { %v788_v54 = vpop.f32.mrf.mxu0 }
 0x1e5   : > { %v789_v55 = vadd.f32 %v1720_v53, %v788_v54 }
 0x1e7   : > { %v2121_v56 = vpack.c.bf16 %v789_v55, %v789_v55 }
 0x1e9   : > { %839 = vrot.lane.b32.xlu0 %v2121_v56, %s1854_s22  ;;  %804 = vrot.lane.b32.xlu2 %v2121_v56, %s1855_s15  ;;  %794 = vst.msk [vmem:[#allocation2] sm:$0xf] %vm793_vm10, %v2121_v56 }
 0x1ea   : > { %809 = vrot.lane.b32.xlu1 %v2121_v56, %s1856_s21  ;;  %s2343_s21 = sld [smem:[#allocation26_spill]] }
 0x1ec   : > { %v790_v57 = vpop.f32.mrf.mxu0 }
 0x1f0   : > { %v857_v2 = vld [vmem:[#allocation2] sm:$0xf] }
 0x1f1   : > { %819 = vrot.lane.b32.xlu2 %v2121_v56, %s1857_s29  ;;  %s2344_s29 = scalar_lea.vmem %s2343_s21, %s2022_s24  ;;  %s1323_s21 = sshll.u32 %s2086_s12, 4  ;;  %s1324_s21 = int_to_ptr.vmem [resolvable:$true] %s1323_s21 }
 0x1f2   : > { %824 = vrot.lane.b32.xlu1 %v2121_v56, %s1858_s20 }
 0x1f9   : > { %796 = vrot.lane.b32.xlu2 %v2121_v56, %s1859_s17  ;;  %s2345_s17 = sld [smem:[#allocation27_spill]] }
 0x1fa   : > { %834 = vrot.lane.b32.xlu1 %v2121_v56, %s1860_s30 }
 0x1ff   : > { %s2346_s30 = scalar_lea.vmem %s2345_s17, %s2022_s24 }
 0x243   : > { %v805_v58 = vpop.permute.xlu2 %804 }
 0x244   : > { %808 = vst.msk [vmem:[#allocation2 + $0x4] sm:$0xf] %vm793_vm10, %v805_v58 }
 0x24b   : > { %v820_v59 = vpop.permute.xlu2 %819  ;;  %v858_v10 = vld [vmem:[#allocation2 + $0x4] sm:$0xf] }
 0x24c   : > { %823 = vst.msk [vmem:[#allocation2 + $0x8] sm:$0xf] %vm793_vm10, %v820_v59 }
 0x253   : > { %v797_v60 = vpop.permute.xlu2 %796  ;;  %v859_v13 = vld [vmem:[#allocation2 + $0x8] sm:$0xf] }
 0x254   : > { %799 = vst.msk [vmem:[#allocation3] sm:$0xf] %vm793_vm10, %v797_v60 }
 0x25b   : > { %v840_v61 = vpop.permute.xlu0 %839  ;;  %v849_v62 = vld [vmem:[#allocation3] sm:$0xf] }
 0x25c   : > { %843 = vst.msk [vmem:[#allocation3 + $0xc] sm:$0xf] %vm793_vm10, %v840_v61  ;;  %v810_v63 = vpop.permute.xlu1 %809  ;;  %v866_v0 = vsel %vm861_vm11, %v849_v62, 0 }
 0x25d   : > { %813 = vst.msk [vmem:[#allocation3 + $0x4] sm:$0xf] %vm793_vm10, %v810_v63  ;;  %875 = vmatpush.bf16.xpose.msra.mxu1 %v866_v0 }
 0x263   : > { %v852_v3 = vld [vmem:[#allocation3 + $0xc] sm:$0xf] }
 0x264   : > { %v825_v4 = vpop.permute.xlu1 %824  ;;  %1550 = vmatmul.msk.bf16.vlgmr.msra.gmra.mxu1 %vm861_vm11, %v857_v2  ;;  %v850_v5 = vld [vmem:[#allocation3 + $0x4] sm:$0xf]  ;;  %v923_v6 = vsel %vm861_vm11, %v852_v3, 0 }
 0x265   : > { %828 = vst.msk [vmem:[#allocation3 + $0x8] sm:$0xf] %vm793_vm10, %v825_v4  ;;  %v885_v7 = vsel %vm861_vm11, %v850_v5, 0  ;;  %932 = vmatpush.bf16.xpose.msrb.mxu0 %v923_v6 }
 0x266   : > { %894 = vmatpush.bf16.xpose.msra.mxu2 %v885_v7 }
 0x26c   : > { %v835_v8 = vpop.permute.xlu1 %834  ;;  %v851_v11 = vld [vmem:[#allocation3 + $0x8] sm:$0xf] }
 0x26d   : > { %838 = vst.msk [vmem:[#allocation2 + $0xc] sm:$0xf] %vm793_vm10, %v835_v8  ;;  %1551 = vmatmul.msk.bf16.vlgmr.msra.gmra.mxu2 %vm861_vm11, %v858_v10  ;;  %v904_v12 = vsel %vm861_vm11, %v851_v11, 0 }
 0x26e   : > { %913 = vmatpush.bf16.xpose.msra.mxu3 %v904_v12 }
 0x274   : > { %v860_v14 = vld [vmem:[#allocation2 + $0xc] sm:$0xf] }
 0x275   : > { %1552 = vmatmul.msk.bf16.vlgmr.msra.gmra.mxu3 %vm861_vm11, %v859_v13  ;;  %1553 = vmatmul.msk.bf16.vlgmr.msrb.gmra.mxu0 %vm861_vm11, %v860_v14 }
 0x2e1   : > { %v877_v15 = vpop.f32.mrf.mxu1 }
 0x2e2   : > { %v941_v33 = vsel %vm940_vm13, -1e+30, %v877_v15 }
 0x2e3   : > { %v945_v35 = vsel %vm861_vm11, %v941_v33, -inf }
 0x2e9   : > { %v879_v19 = vpop.f32.mrf.mxu1 }
 0x2f0   : > { %v896_v21 = vpop.f32.mrf.mxu2 }
 0x2f1   : > { %v942_v22 = vsel %vm940_vm13, -1e+30, %v896_v21 }
 0x2f2   : > { %v934_v24 = vpop.f32.mrf.mxu0  ;;  %v948_v25 = vsel %vm861_vm11, %v942_v22, -inf }
 0x2f3   : > { %v944_v26 = vsel %vm940_vm13, -1e+30, %v934_v24  ;;  %949 = vmax.xlane.f32.xlu1 %v948_v25 }
 0x2f4   : > { %v954_v27 = vsel %vm861_vm11, %v944_v26, -inf }
 0x2f5   : > { %955 = vmax.xlane.f32.xlu0 %v954_v27 }
 0x2f8   : > { %v898_v28 = vpop.f32.mrf.mxu2  ;;  %v915_v29 = vpop.f32.mrf.mxu3 }
 0x2f9   : > { %v943_v30 = vsel %vm940_vm13, -1e+30, %v915_v29 }
 0x2fa   : > { %v936_v31 = vpop.f32.mrf.mxu0  ;;  %v951_v32 = vsel %vm861_vm11, %v943_v30, -inf }
 0x2fb   : > { %952 = vmax.xlane.f32.xlu2 %v951_v32 }
 0x300   : > { %v917_v34 = vpop.f32.mrf.mxu3 }
 0x303   : > { %946 = vmax.xlane.f32.xlu2 %v945_v35  ;;  %v1619_v35 = vld [vmem:[%s2342_s26 + $0x8] sm:$0xff] }
 0x309   : > { %829 = vrot.lane.b32.xlu0 %v2121_v56, %s1862_s18 }
 0x30c   : > { %814 = vrot.lane.b32.xlu1 %v2121_v56, %s1863_s16  ;;  %s2348_s16 = sld [smem:[#allocation13_spill]] }
 0x311   : > { %800 = vrot.lane.b32.xlu0 %v2121_v56, %s1864_s19 }
 0x366   : > { %v950_v36 = vpop.xlane.xlu1 %949 }
 0x367   : > { %v958_v37 = vsub.f32 %v942_v22, %v950_v36  ;;  %v1618_v36 = vld [vmem:[%s2342_s26] sm:$0xff] }
 0x368   : > { %v956_v38 = vpop.xlane.xlu0 %955 }
 0x369   : > { %v963_v39 = vmul.f32 1.442695, %v958_v37  ;;  %v960_v40 = vsub.f32 %v944_v26, %v956_v38 }
 0x36b   : > { %1734 = vpow2.f32 %v963_v39  ;;  %v967_v41 = vmul.f32 1.442695, %v960_v40 }
 0x36d   : > { %1736 = vpow2.f32 %v967_v41  ;;  %v1721_v41 = vld [vmem:[%s2344_s29] ss:$0 sm:$0xff] }
 0x36e   : > { %v953_v42 = vpop.xlane.xlu2 %952 }
 0x36f   : > { %v959_v43 = vsub.f32 %v943_v30, %v953_v42 }
 0x371   : > { %v1735_v44 = vpop.eup %1734  ;;  %v965_v45 = vmul.f32 1.442695, %v959_v43 }
 0x372   : > { %v972_v46 = vsel %vm861_vm11, %v1735_v44, 0.0 }
 0x373   : > { %v1737_v47 = vpop.eup %1736  ;;  %1738 = vpow2.f32 %v965_v45  ;;  %973 = vadd.xlane.f32.xlu2 %v972_v46 }
 0x374   : > { %v978_v48 = vsel %vm861_vm11, %v1737_v47, 0.0 }
 0x375   : > { %979 = vadd.xlane.f32.xlu1 %v978_v48 }
 0x376   : > { %v947_v49 = vpop.xlane.xlu2 %946 }
 0x377   : > { %v957_v50 = vsub.f32 %v941_v33, %v947_v49 }
 0x379   : > { %v1739_v51 = vpop.eup %1738  ;;  %v961_v52 = vmul.f32 1.442695, %v957_v50 }
 0x37a   : > { %v975_v53 = vsel %vm861_vm11, %v1739_v51, 0.0 }
 0x37b   : > { %1740 = vpow2.f32 %v961_v52  ;;  %v830_v54 = vpop.permute.xlu0 %829  ;;  %976 = vadd.xlane.f32.xlu2 %v975_v53  ;;  %v1621_v52 = vld [vmem:[%s2070_s28 + $0x8] sm:$0xff] }
 0x37c   : > { %833 = vst.msk [vmem:[#allocation4 + $0x8] sm:$0xf] %vm793_vm10, %v830_v54 }
 0x37e   : > { %v815_v55 = vpop.permute.xlu1 %814 }
 0x37f   : > { %818 = vst.msk [vmem:[#allocation4 + $0x4] sm:$0xf] %vm793_vm10, %v815_v55 }
 0x381   : > { %v1741_v57 = vpop.eup %1740 }
 0x382   : > { %v969_v58 = vsel %vm861_vm11, %v1741_v57, 0.0 }
 0x383   : > { %v801_v59 = vpop.permute.xlu0 %800  ;;  %970 = vadd.xlane.f32.xlu0 %v969_v58  ;;  %v855_v60 = vld [vmem:[#allocation4 + $0x8] sm:$0xf] }
 0x384   : > { %803 = vst.msk [vmem:[#allocation4] sm:$0xf] %vm793_vm10, %v801_v59  ;;  %v1036_v61 = vsel %vm996_vm14, %v855_v60, 0  ;;  %v1629_v60 = vld [vmem:[%s2084_s8 + $0x38] sm:$0xff] }
 0x385   : > { %1045 = vmatpush.bf16.msrb.mxu3 %v1036_v61 }
 0x386   : > { %v854_v62 = vld [vmem:[#allocation4 + $0x4] sm:$0xf] }
 0x387   : > { %v1017_v63 = vsel %vm996_vm14, %v854_v62, 0  ;;  %v1628_v62 = vld [vmem:[%s2084_s8 + $0x30] sm:$0xff] }
 0x388   : > { %1026 = vmatpush.bf16.msrb.mxu2 %v1017_v63 }
 0x389   : > { %1290 = vmatpush.bf16.msra.mxu3 %v1629_v60 }
 0x38b   : > { %v853_v0 = vld [vmem:[#allocation4] sm:$0xf] }
 0x38c   : > { %v998_v2 = vsel %vm996_vm14, %v853_v0, 0  ;;  %1209 = vmatpush.bf16.msra.mxu2 %v1621_v52 }
 0x38d   : > { %1007 = vmatpush.bf16.msrb.mxu1 %v998_v2  ;;  %1291 = vmatpush.bf16.msra.mxu3 %v1628_v62 }
 0x391   : > { %1123 = vmatpush.bf16.msra.mxu1 %v1619_v35 }
 0x393   : > { %844 = vrot.lane.b32.xlu2 %v2121_v56, %s1865_s23 }
 0x395   : > { %1124 = vmatpush.bf16.msra.mxu1 %v1618_v36 }
 0x3e6   : > { %v974_v3 = vpop.xlane.xlu2 %973 }
 0x3e7   : > { %1742 = vrcp.f32 %v974_v3 }
 0x3e8   : > { %v980_v8 = vpop.xlane.xlu1 %979 }
 0x3ed   : > { %v1743_v4 = vpop.eup %1742 }
 0x3ee   : > { %v986_v5 = vmul.f32 %v1743_v4, %v1735_v44  ;;  %v977_v6 = vpop.xlane.xlu2 %976 }
 0x3ef   : > { %1744 = vrcp.f32 %v977_v6 }
 0x3f0   : > { %v990_v7 = vpack.c.bf16 %v986_v5, %v986_v5  ;;  %1746 = vrcp.f32 %v980_v8  ;;  %v1722_v8 = vld [vmem:[%s2346_s30] ss:$0 sm:$0xff] }
 0x3f2   : > { %1555 = vmatmul.msk.bf16.vlgmr.msrb.gmra.mxu2 %vm861_vm11, %v990_v7 }
 0x3f5   : > { %v1745_v10 = vpop.eup %1744 }
 0x3f6   : > { %v987_v11 = vmul.f32 %v1745_v10, %v1739_v51  ;;  %v971_v12 = vpop.xlane.xlu0 %970  ;;  %v845_v13 = vpop.permute.xlu2 %844 }
 0x3f7   : > { %1748 = vrcp.f32 %v971_v12  ;;  %848 = vst.msk [vmem:[#allocation4 + $0xc] sm:$0xf] %vm793_vm10, %v845_v13  ;;  %v1747_v56 = vpop.eup %1746 }
 0x3f8   : > { %v991_v14 = vpack.c.bf16 %v987_v11, %v987_v11  ;;  %v988_v16 = vmul.f32 %v1747_v56, %v1737_v47 }
 0x3fa   : > { %1556 = vmatmul.msk.bf16.vlgmr.msrb.gmra.mxu3 %vm861_vm11, %v991_v14  ;;  %v992_v21 = vpack.c.bf16 %v988_v16, %v988_v16 }
 0x3fd   : > { %v1749_v15 = vpop.eup %1748 }
 0x3fe   : > { %v985_v17 = vmul.f32 %v1749_v15, %v1741_v57  ;;  %v856_v18 = vld [vmem:[#allocation4 + $0xc] sm:$0xf]  ;;  %v1723_v15 = vld [vmem:[%s664_s0] ss:$0 sm:$0xff] }
 0x3ff   : > { %v1055_v19 = vsel %vm996_vm14, %v856_v18, 0 }
 0x400   : > { %v989_v20 = vpack.c.bf16 %v985_v17, %v985_v17  ;;  %1064 = vmatpush.bf16.msra.mxu0 %v1055_v19 }
 0x402   : > { %1554 = vmatmul.msk.bf16.vlgmr.msrb.gmra.mxu1 %vm861_vm11, %v989_v20  ;;  %v1627_v20 = vld [vmem:[%s2084_s8 + $0x28] sm:$0xff] }
 0x403   : > { %1557 = vmatmul.msk.bf16.vlgmr.msra.gmra.mxu0 %vm861_vm11, %v992_v21  ;;  %1292 = vmatpush.bf16.msra.mxu3 %v1627_v20  ;;  %v1626_v21 = vld [vmem:[%s2084_s8 + $0x20] sm:$0xff] }
 0x407   : > { %1293 = vmatpush.bf16.msra.mxu3 %v1626_v21 }
 0x475   : > { %v1028_v22 = vpop.f32.mrf.mxu2 }
 0x476   : > { %v1072_v24 = vpack.c.bf16 %v1028_v22, %v1028_v22  ;;  %v1625_v22 = vld [vmem:[%s2084_s8 + $0x18] sm:$0xff] }
 0x477   : > { %1294 = vmatpush.bf16.msra.mxu3 %v1625_v22 }
 0x478   : > { %1074 = vrot.lane.b32.xlu2 %v1072_v24, %s1866_s25  ;;  %v1624_v24 = vld [vmem:[%s2084_s8 + $0x10] sm:$0xff]  ;;  %s2350_s25 = sld [smem:[#allocation31_spill]] }
 0x47b   : > { %1295 = vmatpush.bf16.msra.mxu3 %v1624_v24 }
 0x47d   : > { %v1030_v25 = vpop.f32.mrf.mxu2  ;;  %v1047_v26 = vpop.f32.mrf.mxu3 }
 0x47e   : > { %v1079_v27 = vpack.c.bf16 %v1047_v26, %v1047_v26  ;;  %v1623_v25 = vld [vmem:[%s2084_s8 + $0x8] sm:$0xff]  ;;  %v1622_v26 = vld [vmem:[%s2084_s8] sm:$0xff]  ;;  %s2349_s8 = sld [smem:[#allocation10_spill]]  ;;  %s1776_s13 = scalar_lea.hbm %s2350_s25, 16 }
 0x47f   : > { %v1009_v28 = vpop.f32.mrf.mxu1  ;;  %1296 = vmatpush.bf16.msra.mxu3 %v1623_v25 }
 0x480   : > { %v1070_v29 = vpack.c.bf16 %v1009_v28, %v1009_v28  ;;  %1081 = vrot.lane.b32.xlu2 %v1079_v27, %s1867_s27  ;;  %v1066_v30 = vpop.f32.mrf.mxu0  ;;  %v1724_v27 = vld [vmem:[%s672_s6] ss:$0 sm:$0xff]  ;;  %s1609_s6 = sshll.u32 %s2348_s16, 3 }
 0x481   : > { %v1086_v32 = vpack.c.bf16 %v1066_v30, %v1066_v30  ;;  %s1321_s27 = scalar_lea.hbm %s2350_s25, %s1609_s6 }
 0x482   : > { %1071 = vst.msk [vmem:[#allocation5] sm:$0xf] %vm793_vm10, %v1070_v29  ;;  %s1325_s29 = sshll.u32 %s1321_s27, 4  ;;  %s1326_s29 = int_to_ptr.hbm [resolvable:$true] %s1325_s29 }
 0x483   : > { %1297 = vmatpush.bf16.msra.mxu3 %v1622_v26  ;;  %s1770_s17 = sshra.s32 %s1326_s29, 4  ;;  %s1771_s17 = int_to_ptr.hbm [resolvable:$true] %s1770_s17 }
 0x484   : > { %s1772_s30 = scalar_lea.hbm %s1771_s17, 8  ;;  %p1777_p5 = scmp.lt.s32.totalorder %s1771_s17, %s2350_s25 }
 0x485   : > { %v1049_v31 = vpop.f32.mrf.mxu3  ;;  %p1773_p1 = scmp.ne.s32.totalorder %s1771_s17, %s1772_s30  ;;  %p1778_p6 = scmp.lt.s32.totalorder %s1776_s13, %s1772_s30 }
 0x487   : > { %v1011_v33 = vpop.f32.mrf.mxu1  ;;  %p1774_p2 = pnand %p1773_p1, %p1993_p3  ;;  %p1779_p7 = por %p1778_p6, %p1777_p5 }
 0x488   : > { %1088 = vrot.lane.b32.xlu2 %v1086_v32, %s1868_s14  ;;  %v1068_v34 = vpop.f32.mrf.mxu0 }
 0x489   : > { %p1775_p4 = pneg %p1774_p2 }
 0x48b   : > { %p1780_p8 = pnand %p1779_p7, %p1775_p4 }
 0x4d2   : > { %v1075_v37 = vpop.permute.xlu2 %1074 }
 0x4d3   : > { %1078 = vst.msk [vmem:[#allocation5] sm:$0xf] %vm1077_vm15, %v1075_v37 }
 0x4da   : > { %v1082_v38 = vpop.permute.xlu2 %1081 }
 0x4db   : > { %1085 = vst.msk [vmem:[#allocation5] sm:$0xf] %vm1084_vm0, %v1082_v38 }
 0x4e2   : > { %v1089_v39 = vpop.permute.xlu2 %1088 }
 0x4e3   : > { %1092 = vst.msk [vmem:[#allocation5] sm:$0xf] %vm1091_vm2, %v1089_v39 }
 0x4ea   : > { %v1093_v40 = vld [vmem:[#allocation5] sm:$0xf] }
 0x4eb   : > { %1566 = vmatmul.msk.bf16.vlgmr.msra.gmra.mxu1 %vm694_vm1, %v1093_v40 }
 0x568   : > { %v1126_v42 = vpop.f32.mrf.mxu1 }
 0x569   : > { %v1127_v43 = vadd.f32 %v1721_v41, %v1126_v42  ;;  %v1725_v41 = vld [vmem:[%s680_s7] ss:$0 sm:$0xff] }
 0x56b   : > { %v2186_v44 = vadd.f32 %v1127_v43, %v2091_v1  ;;  %v1620_v1 = vld [vmem:[%s2070_s28] sm:$0xff]  ;;  %s2353_s28 = sand.u32 1, %s2349_s8  }
 0x56c   : > { %1210 = vmatpush.bf16.msra.mxu2 %v1620_v1  ;;  %s1311_s20 = scalar_lea.sflag [#allocation7], %s2353_s28 }
 0x56d   : > { %v1133_v45 = vsel %vm694_vm1, %v2186_v44, 0.0 }
 0x56e   : > { %1134 = vadd.xlane.f32.xlu1 %v1133_v45 }
 0x570   : > { %v1128_v46 = vpop.f32.mrf.mxu1 }
 0x5e1   : > { %v1135_v47 = vpop.xlane.xlu1 %1134 }
 0x5e2   : > { %v1136_v48 = vmul.f32 %v1135_v47, %v2095_v9 }
 0x5e4   : > { %v1137_v49 = vsub.f32 %v2186_v44, %v1136_v48 }
 0x5e6   : > { %v1138_v50 = vmul.f32 %v1137_v49, %v1137_v49  ;;  %v1146_v14 = vmul.f32 %v1722_v8, %v1137_v49 }
 0x5e8   : > { %v1139_v51 = vsel %vm694_vm1, %v1138_v50, 0.0 }
 0x5e9   : > { %1140 = vadd.xlane.f32.xlu2 %v1139_v51 }
 0x65c   : > { %v1141_v53 = vpop.xlane.xlu2 %1140 }
 0x65d   : > { %v1142_v54 = vmul.f32 %v1141_v53, %v2102_v23 }
 0x65f   : > { %1750 = vrsqrt.f32 %v1142_v54  ;;  %vm1154_vm3 = vcmp.eq.f32.partialorder %v1142_v54, inf  ;;  %v1157_v0 = vand.u32 2147483648, %v1142_v54  ;;  %vm1156_vm4 = vcmp.eq.f32.partialorder %v1142_v54, 0.0 }
 0x665   : > { %v1751_v55 = vpop.eup %1750 }
 0x666   : > { %v1148_v57 = vmul.f32 %v1751_v55, %v1142_v54 }
 0x668   : > { %v1149_v58 = vmul.f32 %v1751_v55, %v1148_v57 }
 0x66a   : > { %v1150_v9 = vmul.f32 0.5, %v1149_v58 }
 0x66c   : > { %v1151_v59 = vsub.f32 1.5, %v1150_v9 }
 0x66e   : > { %v1152_v61 = vmul.f32 %v1751_v55, %v1151_v59 }
 0x670   : > { %v1153_v63 = vmul.f32 %v1152_v61, %v1142_v54 }
 0x672   : > { %v1155_v2 = vsel %vm1154_vm3, %v1142_v54, %v1153_v63 }
 0x673   : > { %v1158_v3 = vsel %vm1156_vm4, %v1157_v0, %v1155_v2 }
 0x674   : > { %v1159_v4 = vadd.f32 1e-06, %v1158_v3 }
 0x676   : > { %1752 = vrcp.f32 %v1159_v4  ;;  %v1171_v7 = vand.u32 2147483648, %v1159_v4  ;;  %v1169_v11 = vand.u32 2147483647, %v1159_v4  ;;  %vm1165_vm6 = vweird.f32 %v1159_v4 }
 0x678   : > { %v1172_v13 = vor.u32 1.1754944e-38, %v1171_v7  ;;  %vm1170_vm8 = vcmp.eq.f32.partialorder %v1169_v11, 8.507059e+37 }
 0x67c   : > { %v1753_v23 = vpop.eup %1752 }
 0x67d   : > { %v1161_v5 = vmul.f32 %v1753_v23, %v1159_v4  ;;  %vm1166_vm5 = vweird.f32 %v1753_v23 }
 0x67e   : > { %vm1167_vm7 = vmor %vm1165_vm6, %vm1166_vm5 }
 0x67f   : > { %v1162_v6 = vsub.f32 1.0, %v1161_v5 }
 0x681   : > { %v1163_v10 = vmul.f32 %v1753_v23, %v1162_v6 }
 0x683   : > { %v1164_v12 = vadd.f32 %v1753_v23, %v1163_v10 }
 0x685   : > { %v1168_v56 = vsel %vm1167_vm7, %v1753_v23, %v1164_v12 }
 0x686   : > { %v1173_v16 = vsel %vm1170_vm8, %v1172_v13, %v1168_v56 }
 0x687   : > { %v1174_v17 = vmul.f32 %v1173_v16, %v1146_v14 }
 0x689   : > { %v1178_v18 = vadd.f32 %v1723_v15, %v1174_v17 }
 0x68b   : > { %v1179_v19 = vpack.c.bf16 %v1178_v18, %v1178_v18 }
 0x68d   : > { %1575 = vmatmul.msk.bf16.vlgmr.msra.gmra.mxu2 %vm694_vm1, %v1179_v19 }
 0x710   : > { %v1212_v28 = vpop.f32.mrf.mxu2 }
 0x711   : > { %v1213_v29 = vadd.f32 %v1724_v27, %v1212_v28 }
 0x713   : > { %v1217_v30 = vmul.f32 %v1213_v29, %v1213_v29  ;;  %v1216_v37 = vmul.f32 0.5, %v1213_v29 }
 0x715   : > { %v1218_v31 = vmul.f32 %v1217_v30, %v1213_v29 }
 0x717   : > { %v1219_v32 = vmul.f32 0.044715, %v1218_v31 }
 0x718   : > { %v1214_v33 = vpop.f32.mrf.mxu2 }
 0x719   : > { %v1220_v34 = vadd.f32 %v1219_v32, %v1213_v29 }
 0x71b   : > { %v1221_v35 = vmul.f32 0.7978846, %v1220_v34 }
 0x71d   : > { %1754 = vtanh.f32 %v1221_v35 }
 0x723   : > { %v1755_v36 = vpop.eup %1754 }
 0x724   : > { %v1223_v38 = vadd.f32 1.0, %v1755_v36 }
 0x726   : > { %v1224_v39 = vmul.f32 %v1223_v38, %v1216_v37 }
 0x728   : > { %v1225_v40 = vpack.c.bf16 %v1224_v39, %v1224_v39 }
 0x72a   : > { %1298 = vmatmul.bf16.vlgmr.msra.gmra.mxu3 %v1225_v40 }
 0x7ad   : > { %v1299_v42 = vpop.f32.mrf.mxu3 }
 0x7ae   : > { %v1303_v43 = vadd.f32 %v1299_v42, %v2186_v44 }
 0x7b0   : > { %v1308_v45 = vadd.f32 %v1725_v41, %v1303_v43 }
 0x7b2   : > { %1309 = vst.msk [vmem:[%s2086_s12] sm:$0xff] %vm694_vm1, %v1308_v45 }
 0x7b3   : > { %1783 = shalt.err (!%p1780_p8)
}
 0x7b4   : > { %1630 = dma.vmem_to_hbm [thread:$0]  (%p1993_p3), %s1324_s21, 128, %s1326_s29, %s1311_s20  }
 0x7b5   : > { %v1301_v44 = vpop.f32.mrf.mxu3 }
 0x7b6 PF: > { %s2354_s12 = sld [smem:[#allocation16_spill]] }
 0x7b7   : > { %s2355_s11 = sld [smem:[#allocation9_spill]] }
 0x7bc   : > { %p1636_p10 = scmp.ge.s32.totalorder %s2354_s12, 2 }
 0x7bd   : > { %s1337_s16 = sand.u32 1, %s2355_s11  }
 0x7be   : > { %p1633_p11 = pnand %p1636_p10, %p2003_p9  ;;  %s1338_s8 = scalar_lea.sflag [#allocation7], %s1337_s16 }
 0x7c0   : > { %p1634_p12 = pneg %p1633_p11 }
 0x7c2   : > { %1817 = dma.done.wait (%p1634_p12), %s1338_s8, 128  }
 0x7c3   : > { %1819 = vsyncadd (%p1634_p12), %s1338_s8, 4294967168  ;;  %s27_s20 = sadd.s32 1, %s2354_s12   ;;  %s2357_s29 = sld [smem:[#allocation10_spill]] }
 0x7c4   : > { %p24_p13 = scmp.ge.s32.totalorder %s27_s20, 6   ;;  %s2358_s30 = sld [smem:[#allocation11_spill]] }
 0x7c5   : > { %s2359_s15 = sld [smem:[#allocation21_spill]] }
 0x7c6   : > { %s2360_s16 = sld [smem:[#allocation14_spill]]  ;;  %26 = sbr.rel (!%p24_p13) target bundleno = 15 (0xf), region = 163 }
 0x7c7   : > { %s2361_s17 = sld [smem:[#allocation15_spill]] }
 0x7c8   : > { %s2362_s18 = sld [smem:[#allocation17_spill]] }
 0x7c9   : > { %s2363_s19 = sld [smem:[#allocation19_spill]] }
 0x7cb   :  { %1344 = vsyncpa [#allocation7], 1 }
 0x7cc   :  { %1346 = vsyncpa [#allocation7 + $0x1], 1 }

</bundles_post_ra>
